<compile_context>
chip_gen: v7x
topology: tpu7x:2x2x1
jax: 0.10.0
libtpu: 0.0.40
codegen_flags: <defaults>
</compile_context>

<pallas_src>
import math

import jax
import jax.numpy as jnp
from jax.experimental import pallas as pl
from jax.experimental.pallas import tpu as pltpu


# -----------------------------------------------------------------------------
# Kernels
# -----------------------------------------------------------------------------
def _layer1_kernel(adj_ref, w1_ref, b1_ref, w2_ref, s2_ref, acc_ref):
    """Computes support2[i] = bf16( relu(adj[i,:] @ W1 + b1) @ W2 ).

    Grid = (row tiles i, reduction tiles k). The accumulator lives in f32
    VMEM scratch; bias + relu + the fused h1 @ W2 happen once in the k==last
    finalize while the row tile is resident.
    """
    k = pl.program_id(1)

    @pl.when(k == 0)
    def _init():
        acc_ref[...] = jnp.zeros_like(acc_ref)

    # adj tile (tm, tk) bf16  @  W1 tile (tk, E) bf16  -> f32 accumulate.
    acc_ref[...] += jnp.dot(adj_ref[...], w1_ref[...],
                            preferred_element_type=jnp.float32)

    @pl.when(k == pl.num_programs(1) - 1)
    def _finalize():
        # f32 epilogue: bias + relu (hoisted out of the reduction loop).
        h1 = jnp.maximum(acc_ref[...] + b1_ref[...], 0.0)
        # TODO(synk): dropout(p=0.3) is identity here (eval / inference mode);
        # training-mode dropout would need pltpu.prng_seed/prng_random_bits.
        # Fuse the second layer's input transform while the tile is resident.
        s2 = jnp.dot(h1.astype(jnp.bfloat16), w2_ref[...],
                     preferred_element_type=jnp.float32)
        s2_ref[...] = s2.astype(s2_ref.dtype)


def _layer2_kernel(adj_ref, s2_ref, b2_ref, out_ref, acc_ref):
    """Computes out[i] = adj[i,:] @ support2 + b2 (f32 output)."""
    k = pl.program_id(1)

    @pl.when(k == 0)
    def _init():
        acc_ref[...] = jnp.zeros_like(acc_ref)

    acc_ref[...] += jnp.dot(adj_ref[...], s2_ref[...],
                            preferred_element_type=jnp.float32)

    @pl.when(k == pl.num_programs(1) - 1)
    def _finalize():
        out_ref[...] = acc_ref[...] + b2_ref[...]


# -----------------------------------------------------------------------------
# Wrapper
# -----------------------------------------------------------------------------
def _pick_tile(n):
    """MXU-friendly tile: prefer 256 (v6e/v7x 2x256x256 geometry), then 128
    (v5e 4x128x128); fall back to the full extent for small / ragged n."""
    for t in (256, 128):
        if n % t == 0:
            return t
    return n


def gcn_forward(adj, w1, b1, w2, b2):
    """Fused 2-layer GCN forward (eval mode) on TPU via Pallas.

    out = adj @ (relu(adj @ W1 + b1) @ W2) + b2      (x = I is folded away)
    """
    n = adj.shape[0]
    emb = w1.shape[1]

    # bf16 operands for the MXU; f32 accumulation inside the kernels.
    adj_bf = adj.astype(jnp.bfloat16)
    w1_bf = w1.astype(jnp.bfloat16)
    w2_bf = w2.astype(jnp.bfloat16)
    b1_f32 = b1.astype(jnp.float32)
    b2_f32 = b2.astype(jnp.float32)

    tm = _pick_tile(n)   # output-row tile
    tk = _pick_tile(n)   # reduction (adj column) tile

    grid = (n // tm, n // tk)
    sems = pltpu.CompilerParams(
        dimension_semantics=("parallel", "arbitrary"))

    # ---- Layer 1 (+ fused h1 @ W2): support2 = relu(adj @ W1 + b1) @ W2 ----
    support2 = pl.pallas_call(
        _layer1_kernel,
        out_shape=jax.ShapeDtypeStruct((n, emb), jnp.bfloat16),
        grid_spec=pltpu.PrefetchScalarGridSpec(
            num_scalar_prefetch=0,
            grid=grid,
            in_specs=[
                pl.BlockSpec((tm, tk), lambda i, k: (i, k)),   # adj
                pl.BlockSpec((tk, emb), lambda i, k: (k, 0)),  # W1
                pl.BlockSpec((1, emb), lambda i, k: (0, 0)),   # b1 (f32)
                pl.BlockSpec((emb, emb), lambda i, k: (0, 0)), # W2 (resident)
            ],
            out_specs=pl.BlockSpec((tm, emb), lambda i, k: (i, 0)),
            scratch_shapes=[pltpu.VMEM((tm, emb), jnp.float32)],
        ),
        compiler_params=sems,
    )(adj_bf, w1_bf, b1_f32, w2_bf)

    # ---- Layer 2: out = adj @ support2 + b2 ----
    out = pl.pallas_call(
        _layer2_kernel,
        out_shape=jax.ShapeDtypeStruct((n, emb), jnp.float32),
        grid_spec=pltpu.PrefetchScalarGridSpec(
            num_scalar_prefetch=0,
            grid=grid,
            in_specs=[
                pl.BlockSpec((tm, tk), lambda i, k: (i, k)),   # adj
                pl.BlockSpec((tk, emb), lambda i, k: (k, 0)),  # support2
                pl.BlockSpec((1, emb), lambda i, k: (0, 0)),   # b2 (f32)
            ],
            out_specs=pl.BlockSpec((tm, emb), lambda i, k: (i, 0)),
            scratch_shapes=[pltpu.VMEM((tm, emb), jnp.float32)],
        ),
        compiler_params=sems,
    )(adj_bf, support2, b2_f32)

    return out


# -----------------------------------------------------------------------------
# Module-matching helpers
# -----------------------------------------------------------------------------
def row_normalize(mx):
    """Row-normalize a dense matrix (matches GCN.normalize)."""
    rowsum = mx.sum(axis=1)
    r_inv = jnp.where(rowsum == 0.0, 0.0, 1.0 / rowsum)
    return mx * r_inv[:, None]


def init_gcn_params(key, voc_size, emb_dim):
    """Deterministic init matching GraphConvolution.reset_parameters."""
    k1, k2, k3, k4 = jax.random.split(key, 4)
    stdv = 1.0 / math.sqrt(emb_dim)  # weight.size(1) == emb_dim for both layers
    w1 = jax.random.uniform(k1, (voc_size, emb_dim), jnp.float32, -stdv, stdv)
    b1 = jax.random.uniform(k2, (1, emb_dim), jnp.float32, -stdv, stdv)
    w2 = jax.random.uniform(k3, (emb_dim, emb_dim), jnp.float32, -stdv, stdv)
    b2 = jax.random.uniform(k4, (1, emb_dim), jnp.float32, -stdv, stdv)
    return w1, b1, w2, b2


if __name__ == "__main__":
    # Lane-dense, (8,128)-aligned sizes (perf feedback): E = 128 fills the
    # 128-lane axis; N = 512 gives a 2x2 grid of 256x256 MXU-aligned tiles.
    voc_size = 512
    emb_dim = 128

    key = jax.random.PRNGKey(0)
    k_adj, k_params = jax.random.split(key)

    # Synthetic binary adjacency, then self-loops + row-normalize,
    # exactly as GCN.__init__ does.
    adj_raw = (jax.random.uniform(k_adj, (voc_size, voc_size)) > 0.9).astype(
        jnp.float32)
    adj = row_normalize(adj_raw + jnp.eye(voc_size, dtype=jnp.float32))

    w1, b1, w2, b2 = init_gcn_params(k_params, voc_size, emb_dim)

    out = gcn_forward(adj, w1, b1, w2, b2)
    out = jax.block_until_ready(out)

    # Pure-JAX reference mirroring the kernel's precision path
    # (x = I folded away; bf16 matmul operands, f32 accumulation).
    adj_bf = adj.astype(jnp.bfloat16)
    w1_bf = w1.astype(jnp.bfloat16)
    w2_bf = w2.astype(jnp.bfloat16)
    h1 = jnp.maximum(
        jnp.dot(adj_bf, w1_bf, preferred_element_type=jnp.float32) + b1, 0.0)
    s2 = jnp.dot(h1.astype(jnp.bfloat16), w2_bf,
                 preferred_element_type=jnp.float32).astype(jnp.bfloat16)
    ref = jnp.dot(adj_bf, s2, preferred_element_type=jnp.float32) + b2

    assert out.shape == (voc_size, emb_dim)
    assert out.dtype == jnp.float32
    assert jnp.allclose(out, ref, atol=1e-2, rtol=1e-2), (
        float(jnp.max(jnp.abs(out - ref))))

    print("KERNEL_OK")
</pallas_src>

<mosaic_0001>
module attributes {stable_mosaic.version = 11 : i64} {
  func.func @_layer1_kernel(%arg0: i32, %arg1: i32, %arg2: memref<256x256xbf16, #tpu.memory_space<vmem>>, %arg3: memref<256x128xbf16, #tpu.memory_space<vmem>>, %arg4: memref<1x128xf32, #tpu.memory_space<vmem>>, %arg5: memref<128x128xbf16, #tpu.memory_space<vmem>>, %arg6: memref<256x128xbf16, #tpu.memory_space<vmem>>, %arg7: memref<256x128xf32, #tpu.memory_space<vmem>>) attributes {dimension_semantics = [#tpu.dimension_semantics<parallel>, #tpu.dimension_semantics<arbitrary>], iteration_bounds = array<i64: 2, 2>, scalar_prefetch = 0 : i64, scratch_operands = 1 : i64, tpu.core_type = #tpu.core_type<tc>, window_params = [{transform_indices = @transform_0, window_bounds = array<i64: 256, 256>}, {transform_indices = @transform_1, window_bounds = array<i64: 256, 128>}, {pipeline_mode = #tpu.pipeline_mode<synchronous>, transform_indices = @transform_2, window_bounds = array<i64: 1, 128>}, {pipeline_mode = #tpu.pipeline_mode<synchronous>, transform_indices = @transform_3, window_bounds = array<i64: 128, 128>}, {transform_indices = @transform_4, window_bounds = array<i64: 256, 128>}]} {
    %c0_i32 = arith.constant 0 : i32
    %0 = arith.cmpi eq, %arg1, %c0_i32 : i32
    %1 = arith.extui %0 : i1 to i32
    %c0_i32_0 = arith.constant 0 : i32
    %2 = arith.cmpi ne, %1, %c0_i32_0 : i32
    scf.if %2 {
      %cst_9 = arith.constant 0.000000e+00 : f32
      %12 = vector.broadcast %cst_9 : f32 to vector<256x128xf32>
      %c0_10 = arith.constant 0 : index
      %c0_11 = arith.constant 0 : index
      %13 = vector.load %arg7[%c0_10, %c0_11] : memref<256x128xf32, #tpu.memory_space<vmem>>, vector<256x128xf32>
      tpu.vector_store %arg7[%c0_10, %c0_11], %12 {strides = array<i32>} : memref<256x128xf32, #tpu.memory_space<vmem>>, vector<256x128xf32>,
    } else {
    }
    %c0 = arith.constant 0 : index
    %c0_1 = arith.constant 0 : index
    %3 = vector.load %arg7[%c0, %c0_1] : memref<256x128xf32, #tpu.memory_space<vmem>>, vector<256x128xf32>
    %c0_2 = arith.constant 0 : index
    %c0_3 = arith.constant 0 : index
    %4 = vector.load %arg2[%c0_2, %c0_3] : memref<256x256xbf16, #tpu.memory_space<vmem>>, vector<256x256xbf16>
    %c0_4 = arith.constant 0 : index
    %c0_5 = arith.constant 0 : index
    %5 = vector.load %arg3[%c0_4, %c0_5] : memref<256x128xbf16, #tpu.memory_space<vmem>>, vector<256x128xbf16>
    %cst = arith.constant dense<0.000000e+00> : vector<256x128xf32>
    %6 = tpu.matmul %4, %5, %cst {dimension_numbers = #tpu.dot_dimension_numbers<[1], [0], [0], [1], [0, 0, 1, 1], [], []>} : vector<256x256xbf16>, vector<256x128xbf16>, vector<256x128xf32> -> vector<256x128xf32>
    %7 = arith.addf %3, %6 : vector<256x128xf32>
    %c0_6 = arith.constant 0 : index
    %c0_7 = arith.constant 0 : index
    %8 = vector.load %arg7[%c0_6, %c0_7] : memref<256x128xf32, #tpu.memory_space<vmem>>, vector<256x128xf32>
    tpu.vector_store %arg7[%c0_6, %c0_7], %7 {strides = array<i32>} : memref<256x128xf32, #tpu.memory_space<vmem>>, vector<256x128xf32>,
    %c1_i32 = arith.constant 1 : i32
    %9 = arith.cmpi eq, %arg1, %c1_i32 : i32
    %10 = arith.extui %9 : i1 to i32
    %c0_i32_8 = arith.constant 0 : i32
    %11 = arith.cmpi ne, %10, %c0_i32_8 : i32
    scf.if %11 {
      %c0_9 = arith.constant 0 : index
      %c0_10 = arith.constant 0 : index
      %12 = vector.load %arg7[%c0_9, %c0_10] : memref<256x128xf32, #tpu.memory_space<vmem>>, vector<256x128xf32>
      %c0_11 = arith.constant 0 : index
      %c0_12 = arith.constant 0 : index
      %13 = vector.load %arg4[%c0_11, %c0_12] : memref<1x128xf32, #tpu.memory_space<vmem>>, vector<1x128xf32>
      %14 = vector.broadcast %13 : vector<1x128xf32> to vector<256x128xf32>
      %15 = arith.addf %12, %14 : vector<256x128xf32>
      %cst_13 = arith.constant 0.000000e+00 : f32
      %16 = vector.broadcast %cst_13 : f32 to vector<256x128xf32>
      %17 = arith.maximumf %15, %16 : vector<256x128xf32>
      %18 = arith.truncf %17 : vector<256x128xf32> to vector<256x128xbf16>
      %c0_14 = arith.constant 0 : index
      %c0_15 = arith.constant 0 : index
      %19 = vector.load %arg5[%c0_14, %c0_15] : memref<128x128xbf16, #tpu.memory_space<vmem>>, vector<128x128xbf16>
      %cst_16 = arith.constant dense<0.000000e+00> : vector<256x128xf32>
      %20 = tpu.matmul %18, %19, %cst_16 {dimension_numbers = #tpu.dot_dimension_numbers<[1], [0], [0], [1], [0, 0, 1, 1], [], []>} : vector<256x128xbf16>, vector<128x128xbf16>, vector<256x128xf32> -> vector<256x128xf32>
      %21 = arith.truncf %20 : vector<256x128xf32> to vector<256x128xbf16>
      %c0_17 = arith.constant 0 : index
      %c0_18 = arith.constant 0 : index
      %22 = vector.load %arg6[%c0_17, %c0_18] : memref<256x128xbf16, #tpu.memory_space<vmem>>, vector<256x128xbf16>
      tpu.vector_store %arg6[%c0_17, %c0_18], %21 {strides = array<i32>} : memref<256x128xbf16, #tpu.memory_space<vmem>>, vector<256x128xbf16>,
    } else {
    }
    return
  }
  func.func @transform_0(%arg0: i32, %arg1: i32) -> (i32, i32) {
    %c0_i32 = arith.constant 0 : i32
    return %arg0, %arg1 : i32, i32
  }
  func.func @transform_1(%arg0: i32, %arg1: i32) -> (i32, i32) {
    %c0_i32 = arith.constant 0 : i32
    %c0_i32_0 = arith.constant 0 : i32
    return %arg1, %c0_i32 : i32, i32
  }
  func.func @transform_2(%arg0: i32, %arg1: i32) -> (i32, i32) {
    %c0_i32 = arith.constant 0 : i32
    %c0_i32_0 = arith.constant 0 : i32
    %c0_i32_1 = arith.constant 0 : i32
    return %c0_i32, %c0_i32_0 : i32, i32
  }
  func.func @transform_3(%arg0: i32, %arg1: i32) -> (i32, i32) {
    %c0_i32 = arith.constant 0 : i32
    %c0_i32_0 = arith.constant 0 : i32
    %c0_i32_1 = arith.constant 0 : i32
    return %c0_i32, %c0_i32_0 : i32, i32
  }
  func.func @transform_4(%arg0: i32, %arg1: i32) -> (i32, i32) {
    %c0_i32 = arith.constant 0 : i32
    %c0_i32_0 = arith.constant 0 : i32
    return %arg0, %c0_i32 : i32, i32
  }
}

</mosaic_0001>

<bundles_post_ra>
// kernel: tpu_custom_call.1
= control target key start
LH: loop header
LB: loop body
LE: loop exit
PB: predicated region body
PF: predicated region fallthrough
CT: control target
= control target key end

     0   :  { %s2994_s0 = inlined_call_operand.hbm [shape: bf16[512,512], index: 0, kind: input, shape index: {}]   ;;  %s2995_s1 = inlined_call_operand.hbm [shape: bf16[512,128], index: 1, kind: input, shape index: {}]   ;;  %s2996_s2 = inlined_call_operand.vmem [shape: f32[1,128], index: 2, kind: input, shape index: {}]   ;;  %s2997_s3 = inlined_call_operand.hbm [shape: bf16[128,128], index: 3, kind: input, shape index: {}]   ;;  %s2998_s4 = inlined_call_operand.hbm [shape: bf16[512,128], index: 4, kind: output, shape index: {}]  }
   0x1   :  { %3021 = sst [smem:[#allocation24_spill]] %s2996_s2 }
   0x2   :  { %3022 = sst [smem:[#allocation25_spill]] %s2997_s3 }
   0x3   :  { %3023 = sst [smem:[#allocation26_spill]] %s2998_s4 }
   0x4   :  { %9 = vsyncpa [#allocation4], 0 }
   0x5   :  { %11 = vsyncpa [#allocation4 + $0x1], 0 }
   0x6   :  { %12 = vsyncpa [#allocation7], 0 }
   0x7   :  { %14 = vsyncpa [#allocation7 + $0x1], 0 }
   0x8   :  { %15 = vsyncpa [#allocation5], 0 }
   0x9   :  { %17 = vsyncpa [#allocation5 + $0x1], 0  ;;  %s2509_s15 = smov 0   ;;  %s2511_s16 = smov 0  }
   0xa   :  { %s2513_s17 = smov 0   ;;  %s2515_s18 = smov 0  }
   0xb   :  { %s2517_s19 = smov 0   ;;  %s2519_s20 = smov 0  }
   0xc   :  { %s2521_s21 = smov 0   ;;  %s2523_s22 = smov 0  }
   0xd   :  { %s2525_s23 = smov 0   ;;  %s2527_s24 = smov 0  }
   0xe   :  { %s2529_s25 = smov 0   ;;  %s2531_s26 = smov 0  }
   0xf   :  { %s2533_s27 = smov 0   ;;  %s2535_s28 = smov 0  }
  0x10 LB: > { %3024 = sst [smem:[#allocation14_spill]] %s2418_s15  ;;  %s2576_s29 = sadd.s32 4294967295, %s2470_s28   ;;  %s2470_s28 = sphi %s2535_s28, %s23_s28   ;;  %s2466_s27 = sphi %s2533_s27, %s3084_s27   ;;  %s2462_s26 = sphi %s2531_s26, %s3083_s26   ;;  %s2458_s25 = sphi %s2529_s25, %s3082_s25   ;;  %s2454_s24 = sphi %s2527_s24, %s3081_s24   ;;  %s2450_s23 = sphi %s2525_s23, %s3080_s23   ;;  %s2446_s22 = sphi %s2523_s22, %s3079_s22   ;;  %s2442_s21 = sphi %s2521_s21, %s3078_s21   ;;  %s2438_s20 = sphi %s2519_s20, %s3077_s20   ;;  %s2434_s19 = sphi %s2517_s19, %s3076_s19   ;;  %s2430_s18 = sphi %s2515_s18, %s3075_s18   ;;  %s2426_s17 = sphi %s2513_s17, %s3074_s17   ;;  %s2422_s16 = sphi %s2511_s16, %s3073_s16   ;;  %s2418_s15 = sphi %s2509_s15, %s3070_s15  }
  0x11   : > { %3025 = sst [smem:[#allocation15_spill]] %s2422_s16  ;;  %s1547_s30 = sadd.s32 4294967294, %s2470_s28  }
  0x12   : > { %3026 = sst [smem:[#allocation16_spill]] %s2454_s24  ;;  %p57_p0 = scmp.ne.s32.totalorder %s2446_s22, %s2442_s21 }
  0x13   : > { %3027 = sst [smem:[#allocation17_spill]] %s2458_s25  ;;  %p3001_p1 = scmp.eq.s32.totalorder %s2576_s29, 0 }
  0x14   : > { %3028 = sst [smem:[#allocation18_spill]] %s2576_s29  ;;  %p83_p2 = scmp.ne.s32.totalorder %s2434_s19, %s2430_s18 }
  0x15   : > { %p2585_p3 = por %p3001_p1, %p57_p0  ;;  %p148_p4 = scmp.ne.s32.totalorder %s2426_s17, %s2422_s16 }
  0x16   : > { %p2593_p5 = por %p83_p2, %p3001_p1  ;;  %p149_p6 = scmp.eq.s32.totalorder %s2576_s29, 3 }
  0x17   : > { %s3029_s6 = scalar_select %p2585_p3, 1, 0 }
  0x18   : > { %s3030_s7 = scalar_select %p2593_p5, 1, 0 }
  0x19   : > { %p154_p7 = scmp.ne.s32.totalorder %s2422_s16, %s2418_s15  ;;  %p155_p8 = scmp.eq.s32.totalorder %s1547_s30, 3 }
  0x1a   : > { %3031 = sst [smem:[#allocation19_spill]] %s3030_s7  ;;  %p2600_p9 = por %p149_p6, %p148_p4 }
  0x1b   : > { %p1548_p10 = scmp.ge.s32.totalorder %s2470_s28, 1  ;;  %p2605_p11 = por %p155_p8, %p154_p7 }
  0x1c   : > { %s3032_s8 = scalar_select %p2600_p9, 1, 0 }
  0x1d   : > { %s3034_s9 = scalar_select %p2605_p11, 1, 0 }
  0x1e   : > { %3033 = sst [smem:[#allocation20_spill]] %s3032_s8  ;;  %p162_p12 = scmp.lt.s32.totalorder %s2470_s28, 5 }
  0x1f   : > { %3035 = sst [smem:[#allocation21_spill]] %s3034_s9  ;;  %s2472_s11 = smov [#allocation8]  }
  0x20   : > { %p2610_p13 = pnand %p1548_p10, %p162_p12  ;;  %s177_s12 = sshll.u32 %s2472_s11, 4  ;;  %s178_s12 = int_to_ptr.vmem [resolvable:$true] %s177_s12 }
  0x21   : > { %s3038_s3 = sld [smem:[#allocation25_spill]] }
  0x22   : > { %s3036_s10 = scalar_select %p2610_p13, 1, 0 }
  0x23   : > { %p2016_p0 = pneg %p2610_p13 }
  0x25   : > { %p2618_p2 = pnand %p2016_p0, %p3001_p1 }
  0x27   : > { %s2228_s21 = scalar_lea.hbm %s3038_s3, 1024  ;;  %p2230_p6 = pneg %p2618_p2 }
  0x28   : > { %p2229_p4 = scmp.ne.s32.totalorder %s3038_s3, %s2228_s21  ;;  %p2235_p10 = scmp.lt.u32.totalorder %s2228_s21, %s3038_s3 }
  0x2a   : > { %p2231_p7 = pnand %p2230_p6, %p2229_p4 }
  0x2c   : > { %p2232_p8 = pneg %p2231_p7 }
  0x2e   : > { %p2237_p12 = pnand %p2235_p10, %p2232_p8 }
  0x30   : > { %2240 = shalt.err (!%p2237_p12)
}
  0x31   : > { %s2241_s15 = scalar_lea.vmem %s178_s12, 1024  ;;  %p2249_p9 = scmp.lt.s32.totalorder %s178_s12, %s178_s12 }
  0x32   : > { %p2242_p0 = scmp.ne.s32.totalorder %s178_s12, %s2241_s15  ;;  %p2250_p5 = scmp.lt.s32.totalorder %s2241_s15, %s2241_s15 }
  0x34   : > { %p2244_p1 = pnand %p2242_p0, %p2230_p6  ;;  %p2251_p3 = por %p2250_p5, %p2249_p9 }
  0x36   : > { %p2245_p11 = pneg %p2244_p1 }
  0x38   : > { %p2252_p13 = pnand %p2251_p3, %p2245_p11 }
  0x3a   : > { %2255 = shalt.err (!%p2252_p13)
}
  0x3b   : > { %s3006_s5 = smov 64   ;;  %s3007_s9 = smov 4  }
  0x3c   : > { %2019 = dma.hbm_to_vmem [thread:$0]  (!%p2618_p2), %s3038_s3, 1024, %s178_s12, [#allocation7], %s3006_s5, %s3006_s5, %s3007_s9  }
  0x3d   : > { %s32_s18 = sadd.s32 1, %s2462_s26  ;;  %s35_s21 = sadd.s32 1, %s2466_s27 }
  0x3e   : > { %p33_p1 = scmp.ge.s32.totalorder %s32_s18, 2  ;;  %s44_s30 = sadd.s32 1, %s2450_s23 }
  0x3f   : > { %p51_p3 = scmp.ne.s32.totalorder %s2450_s23, %s2446_s22  ;;  %p3020_p5 = scmp.eq.s32.totalorder %s2470_s28, 0 }
  0x40   : > { %s3086_s18 = smov (%p33_p1, %s32_s18), 0  ;;  %s3088_s21 = smov (!%p33_p1, %s35_s21), %s2466_s27 }
  0x41   : > { %3039 = sst [smem:[#allocation22_spill]] %s3086_s18  ;;  %s2651_s13 = ssub.s32 %s2462_s26, %s3086_s18 }
  0x42   : > { %p37_p9 = scmp.ge.s32.totalorder %s3088_s21, 2  ;;  %p68_p11 = scmp.eq.s32.totalorder %s2651_s13, 0 }
  0x43   : > { %p2657_p13 = por %p3020_p5, %p51_p3  ;;  %p3019_p2 = scmp.lt.s32.totalorder %s2470_s28, 4 }
  0x44   : > { %s3090_s21 = smov (%p37_p9, %s3088_s21), 0  ;;  %s191_s11 = sand.u32 1, %s2450_s23  }
  0x45   : > { %3041 = sst [smem:[#allocation23_spill]] %s3090_s21  ;;  %s1553_s15 = sshll.u32 %s2462_s26, 1 }
  0x46   : > { %s39_s14 = ssub.s32 %s2466_s27, %s3090_s21  ;;  %s1551_s9 = sshll.u32 %s191_s11, 8 }
  0x47   : > { %s41_s5 = sor.u32 %s2651_s13, %s39_s14  ;;  %p136_p4 = scmp.eq.s32.totalorder %s39_s14, 0 }
  0x48   : > { %p42_p6 = scmp.eq.s32.totalorder %s41_s5, 0  ;;  %s3042_s3 = sadd.s32 1, %s2426_s17 }
  0x49   : > { %s2672_s18 = scalar_select %p136_p4, %s2426_s17, %s3042_s3  }
  0x4a   : > { %s2675_s4 = scalar_select %p42_p6, %s2450_s23, %s44_s30  }
  0x4b   : > { %s1660_s8 = sshll.u32 %s2466_s27, 7  ;;  %s195_s2 = scalar_lea.vmem [#allocation3], %s1551_s9 }
  0x4c   : > { %s202_s25 = sadd.s32 %s1660_s8, %s1553_s15  ;;  %s205_s24 = sshll.u32 %s195_s2, 4  ;;  %s2678_s24 = int_to_ptr.vmem [resolvable:$true] %s205_s24 }
  0x4d   : > { %s1555_s16 = sshll.u32 %s202_s25, 6  ;;  %p2689_p7 = pnand %p3019_p2, %p2657_p13 }
  0x4e   : > { %s2683_s21 = scalar_lea.hbm %s2994_s0, %s1555_s16  ;;  %s2693_s2 = scalar_lea.sflag [#allocation4], %s191_s11 }
  0x4f   : > { %s2256_s25 = scalar_lea.hbm %s2683_s21, 4096  ;;  %p2258_p10 = pneg %p2689_p7 }
  0x50   : > { %p2257_p8 = scmp.ne.s32.totalorder %s2683_s21, %s2256_s25  ;;  %s2261_s7 = scalar_lea.hbm %s2994_s0, 16384 }
  0x51   : > { %p2262_p1 = scmp.lt.u32.totalorder %s2683_s21, %s2994_s0  ;;  %p2263_p3 = scmp.lt.u32.totalorder %s2261_s7, %s2256_s25 }
  0x52   : > { %p2259_p12 = pnand %p2258_p10, %p2257_p8  ;;  %p2265_p13 = scmp.lt.u32.totalorder %s2256_s25, %s2683_s21 }
  0x53   : > { %p2264_p9 = por %p2263_p3, %p2262_p1 }
  0x54   : > { %p2260_p0 = pneg %p2259_p12 }
  0x55   : > { %p2266_p4 = por %p2265_p13, %p2264_p9 }
  0x57   : > { %p2267_p6 = pnand %p2266_p4, %p2260_p0 }
  0x59   : > { %2270 = shalt.err (!%p2267_p6)
}
  0x5a   : > { %s2271_s9 = scalar_lea.vmem %s2678_s24, 4096  ;;  %s2475_s30 = smov [#allocation3]  }
  0x5b   : > { %p2272_p8 = scmp.ne.s32.totalorder %s2678_s24, %s2271_s9  ;;  %s2276_s12 = sshll.u32 %s2475_s30, 4  ;;  %s2277_s12 = int_to_ptr.vmem [resolvable:$false] %s2276_s12 }
  0x5c   : > { %s2278_s11 = scalar_lea.vmem %s2277_s12, 8192  ;;  %p2279_p5 = scmp.lt.s32.totalorder %s2678_s24, %s2277_s12 }
  0x5d   : > { %p2274_p12 = pnand %p2272_p8, %p2258_p10  ;;  %p2280_p1 = scmp.lt.s32.totalorder %s2278_s11, %s2271_s9 }
  0x5f   : > { %p2275_p2 = pneg %p2274_p12  ;;  %p2281_p3 = por %p2280_p1, %p2279_p5 }
  0x61   : > { %p2282_p9 = pnand %p2281_p3, %p2275_p2 }
  0x63   : > { %2285 = shalt.err (!%p2282_p9)
}
  0x64   : > { %s2476_s15 = smov 256   ;;  %s2477_s14 = smov 128  }
  0x65   : > { %s2478_s25 = smov 8   ;;  %s215_s16 = sand.u32 1, %s2470_s28  }
  0x66   : > { %2023 = dma.hbm_to_vmem [thread:$0]  (!%p2689_p7), %s2683_s21, 4096, %s2678_s24, %s2693_s2, %s2476_s15, %s2477_s14, %s2478_s25  }
  0x67   : > { %s70_s29 = sadd.s32 1, %s2438_s20  ;;  %p77_p5 = scmp.ne.s32.totalorder %s2438_s20, %s2434_s19 }
  0x68   : > { %s2728_s7 = scalar_select %p68_p11, %s2438_s20, %s70_s29  }
  0x69   : > { %p3044_p2 = scmp.eq.s32.totalorder %s2470_s28, 0  ;;  %s217_s8 = sand.u32 1, %s2438_s20  }
  0x6a   : > { %s1556_s5 = sshll.u32 %s217_s8, 7  ;;  %s1661_s9 = sshll.u32 %s2462_s26, 11 }
  0x6b   : > { %p79_p10 = por %p77_p5, %p3044_p2  ;;  %s2737_s11 = scalar_lea.hbm %s2995_s1, %s1661_s9 }
  0x6c   : > { %s219_s24 = scalar_lea.vmem [#allocation6], %s1556_s5  ;;  %p3045_p7 = scmp.lt.s32.totalorder %s2470_s28, 4 }
  0x6d   : > { %s226_s21 = sshll.u32 %s219_s24, 4  ;;  %s2747_s3 = scalar_lea.sflag [#allocation7], %s215_s16  ;;  %s2745_s21 = int_to_ptr.vmem [resolvable:$true] %s226_s21 }
  0x6e   : > { %p2741_p0 = pnand %p3045_p7, %p79_p10  ;;  %s2286_s2 = scalar_lea.hbm %s2737_s11, 2048 }
  0x6f   : > { %p2287_p11 = scmp.ne.s32.totalorder %s2737_s11, %s2286_s2  ;;  %s2291_s25 = scalar_lea.hbm %s2995_s1, 4096 }
  0x70   : > { %p2288_p13 = pneg %p2741_p0  ;;  %p2292_p8 = scmp.lt.u32.totalorder %s2737_s11, %s2995_s1 }
  0x71   : > { %p2293_p12 = scmp.lt.u32.totalorder %s2291_s25, %s2286_s2  ;;  %p2295_p3 = scmp.lt.u32.totalorder %s2286_s2, %s2737_s11 }
  0x72   : > { %p2289_p4 = pnand %p2288_p13, %p2287_p11 }
  0x73   : > { %p2294_p1 = por %p2293_p12, %p2292_p8 }
  0x74   : > { %p2290_p6 = pneg %p2289_p4 }
  0x75   : > { %p2296_p9 = por %p2295_p3, %p2294_p1 }
  0x77   : > { %p2297_p5 = pnand %p2296_p9, %p2290_p6 }
  0x79   : > { %2300 = shalt.err (!%p2297_p5)
}
  0x7a   : > { %s2301_s16 = scalar_lea.vmem %s2745_s21, 2048  ;;  %s2479_s5 = smov [#allocation6]  }
  0x7b   : > { %p2302_p2 = scmp.ne.s32.totalorder %s2745_s21, %s2301_s16  ;;  %s2306_s9 = sshll.u32 %s2479_s5, 4  ;;  %s2307_s9 = int_to_ptr.vmem [resolvable:$false] %s2306_s9 }
  0x7c   : > { %s2308_s30 = scalar_lea.vmem %s2307_s9, 4096  ;;  %p2309_p11 = scmp.lt.s32.totalorder %s2745_s21, %s2307_s9 }
  0x7d   : > { %p2304_p10 = pnand %p2302_p2, %p2288_p13  ;;  %p2310_p4 = scmp.lt.s32.totalorder %s2308_s30, %s2301_s16 }
  0x7f   : > { %p2305_p7 = pneg %p2304_p10  ;;  %p2311_p8 = por %p2310_p4, %p2309_p11 }
  0x81   : > { %p2312_p12 = pnand %p2311_p8, %p2305_p7 }
  0x83   : > { %2315 = shalt.err (!%p2312_p12)
}
  0x84   : > { %s3047_s12 = smov 4   ;;  %s3048_s24 = smov 64  }
  0x85   : > { %2026 = dma.hbm_to_vmem [thread:$0]  (!%p2741_p0), %s2737_s11, 2048, %s2745_s21, %s2747_s3, %s3048_s24, %s3048_s24, %s3047_s12  }
  0x86   : > { %p3049_p13 = scmp.ne.s32.totalorder %s3036_s10, 0 }
  0x87   : > { %s240_s2 = sand.u32 (!%p3049_p13), 1, %s2446_s22   ;;  %p3050_p6 = scmp.ne.s32.totalorder (!%p3049_p13), %s3029_s6, 0 }
  0x88   : > { %238 = sbr.rel (%p3049_p13) target bundleno = 766 (0x2fe), region = 36  ;;  %s1560_s15 = sshll.u32 (!%p3049_p13), %s240_s2, 8 }
  0x89   : > { %s241_s14 = scalar_lea.sflag (!%p3049_p13), [#allocation4], %s240_s2  ;;  %s2781_s25 = scalar_lea.vmem (!%p3049_p13), [#allocation3], %s1560_s15 }
  0x8f   : > { %2401 = dma.done.wait (%p3050_p6), %s241_s14, 4096  }
  0x90   : > { %2403 = vsyncadd (%p3050_p6), %s241_s14, 4294963200  ;;  %s3051_s13 = sld [smem:[#allocation18_spill]]  ;;  %s3052_s29 = sld [smem:[#allocation19_spill]] }
  0x91   : > { %s251_s11 = sand.u32 1, %s2434_s19  }
  0x92   : > { %s1561_s21 = sshll.u32 %s251_s11, 7 }
  0x93   : > { %s2789_s3 = scalar_lea.vmem [#allocation6], %s1561_s21 }
  0x96   : > { %s249_s8 = sand.u32 1, %s3051_s13   ;;  %p3053_p0 = scmp.ne.s32.totalorder %s3052_s29, 0 }
  0x97   : > { %s250_s10 = scalar_lea.sflag [#allocation7], %s249_s8 }
  0x98   : > { %2405 = dma.done.wait (%p3053_p0), %s250_s10, 2048  }
  0x99   : > { %2407 = vsyncadd (%p3053_p0), %s250_s10, 4294965248  ;;  %p3054_p1 = scmp.eq.s32.totalorder %s3051_s13, 0 }
  0x9b   : > { %2409 = dma.done.wait (%p3054_p1), [#allocation7], 1024   ;;  %p3055_p3 = pmov %p3054_p1 }
  0x9c   : > { %s3056_s6 = sld [smem:[#allocation15_spill]]  ;;  %s3057_s30 = sld [smem:[#allocation16_spill]] }
  0x9d   : > { %2411 = vsyncadd (%p3055_p3), [#allocation7], 4294966272 }
  0xa2   : > { %s284_s16 = sand.u32 1, %s3056_s6   ;;  %p1564_p9 = scmp.ne.s32.totalorder %s3057_s30, 0 }
  0xa3   : > { %s1563_s5 = sshll.u32 %s284_s16, 7  ;;  %v2480_v0 = vmov (!%p1564_p9), 0.0  }
  0xa4   : > { %s2802_s9 = scalar_lea.vmem [#allocation9], %s1563_s5  ;;  %295 = sbr.rel (%p1564_p9) target bundleno = 180 (0xb4), region = 52  ;;  %296 = vst [vmem:[#allocation2] sm:$0xff] (!%p1564_p9), %v2480_v0  ;;  %297 = vst [vmem:[#allocation2 + $0x8] sm:$0xff] (!%p1564_p9), %v2480_v0 }
  0xa5   : > { %298 = vst [vmem:[#allocation2 + $0x10] sm:$0xff] (!%p1564_p9), %v2480_v0  ;;  %299 = vst [vmem:[#allocation2 + $0x18] sm:$0xff] (!%p1564_p9), %v2480_v0 }
  0xa6   : > { %300 = vst [vmem:[#allocation2 + $0x20] sm:$0xff] (!%p1564_p9), %v2480_v0  ;;  %301 = vst [vmem:[#allocation2 + $0x28] sm:$0xff] (!%p1564_p9), %v2480_v0 }
  0xa7   : > { %302 = vst [vmem:[#allocation2 + $0x30] sm:$0xff] (!%p1564_p9), %v2480_v0  ;;  %303 = vst [vmem:[#allocation2 + $0x38] sm:$0xff] (!%p1564_p9), %v2480_v0 }
  0xa8   : > { %304 = vst [vmem:[#allocation2 + $0x40] sm:$0xff] (!%p1564_p9), %v2480_v0  ;;  %305 = vst [vmem:[#allocation2 + $0x48] sm:$0xff] (!%p1564_p9), %v2480_v0 }
  0xa9   : > { %306 = vst [vmem:[#allocation2 + $0x50] sm:$0xff] (!%p1564_p9), %v2480_v0  ;;  %307 = vst [vmem:[#allocation2 + $0x58] sm:$0xff] (!%p1564_p9), %v2480_v0 }
  0xaa   : > { %308 = vst [vmem:[#allocation2 + $0x60] sm:$0xff] (!%p1564_p9), %v2480_v0  ;;  %309 = vst [vmem:[#allocation2 + $0x68] sm:$0xff] (!%p1564_p9), %v2480_v0 }
  0xab   : > { %310 = vst [vmem:[#allocation2 + $0x70] sm:$0xff] %v2480_v0  ;;  %311 = vst [vmem:[#allocation2 + $0x78] sm:$0xff] %v2480_v0 }
  0xac   : > { %312 = vst [vmem:[#allocation2 + $0x80] sm:$0xff] %v2480_v0  ;;  %313 = vst [vmem:[#allocation2 + $0x88] sm:$0xff] %v2480_v0 }
  0xad   : > { %314 = vst [vmem:[#allocation2 + $0x90] sm:$0xff] %v2480_v0  ;;  %315 = vst [vmem:[#allocation2 + $0x98] sm:$0xff] %v2480_v0 }
  0xae   : > { %316 = vst [vmem:[#allocation2 + $0xa0] sm:$0xff] %v2480_v0  ;;  %317 = vst [vmem:[#allocation2 + $0xa8] sm:$0xff] %v2480_v0 }
  0xaf   : > { %318 = vst [vmem:[#allocation2 + $0xb0] sm:$0xff] %v2480_v0  ;;  %319 = vst [vmem:[#allocation2 + $0xb8] sm:$0xff] %v2480_v0 }
  0xb0   : > { %320 = vst [vmem:[#allocation2 + $0xc0] sm:$0xff] %v2480_v0  ;;  %321 = vst [vmem:[#allocation2 + $0xc8] sm:$0xff] %v2480_v0 }
  0xb1   : > { %322 = vst [vmem:[#allocation2 + $0xd0] sm:$0xff] %v2480_v0  ;;  %323 = vst [vmem:[#allocation2 + $0xd8] sm:$0xff] %v2480_v0 }
  0xb2   : > { %324 = vst [vmem:[#allocation2 + $0xe0] sm:$0xff] %v2480_v0  ;;  %325 = vst [vmem:[#allocation2 + $0xe8] sm:$0xff] %v2480_v0 }
  0xb3   : > { %326 = vst [vmem:[#allocation2 + $0xf0] sm:$0xff] %v2480_v0  ;;  %327 = vst [vmem:[#allocation2 + $0xf8] sm:$0xff] %v2480_v0 }
  0xb4 PF: > { %v2156_v1 = vld [vmem:[%s2789_s3 + $0x40] sm:$0xff]   ;;  %v2158_v3 = vld [vmem:[%s2789_s3 + $0x48] sm:$0xff]   ;;  %v2160_v5 = vld [vmem:[%s2789_s3 + $0x50] sm:$0xff]   ;;  %s3058_s12 = sld [smem:[#allocation16_spill]] }
  0xb5   : > { %v2157_v2 = vld [vmem:[%s2789_s3] sm:$0xff]   ;;  %1790 = vmatprep.subr.bf16.mxu0 %v2156_v1  ;;  %1974 = vmatprep.subr.bf16.mxu1 %v2156_v1  ;;  %v2159_v4 = vld [vmem:[%s2789_s3 + $0x8] sm:$0xff]   ;;  %v2161_v6 = vld [vmem:[%s2789_s3 + $0x10] sm:$0xff]  }
  0xb6   : > { %1791 = vmatpush3.bf16.msra.mxu0 %v2157_v2  ;;  %1982 = vmatpush3.bf16.msra.mxu1 %v2157_v2  ;;  %v2162_v7 = vld [vmem:[%s2789_s3 + $0x58] sm:$0xff]   ;;  %v2164_v9 = vld [vmem:[%s2789_s3 + $0x60] sm:$0xff]   ;;  %v2166_v11 = vld [vmem:[%s2789_s3 + $0x68] sm:$0xff]  }
  0xb7   : > { %1792 = vmatprep.subr.bf16.mxu0 %v2158_v3  ;;  %1975 = vmatprep.subr.bf16.mxu1 %v2158_v3  ;;  %v2163_v8 = vld [vmem:[%s2789_s3 + $0x18] sm:$0xff]   ;;  %v2165_v10 = vld [vmem:[%s2789_s3 + $0x20] sm:$0xff]   ;;  %v2167_v14 = vld [vmem:[%s2789_s3 + $0x28] sm:$0xff]  }
  0xb8   : > { %v2174_v12 = vld [vmem:[%s2781_s25 + $0x4] ss:$8 sps:$4 sm:$0xff]   ;;  %v2168_v15 = vld [vmem:[%s2789_s3 + $0x70] sm:$0xff]   ;;  %v2170_v17 = vld [vmem:[%s2789_s3 + $0x78] sm:$0xff]  }
  0xb9   : > { %v2177_v13 = vld [vmem:[%s2781_s25 + $0x84] ss:$8 sps:$4 sm:$0xff]   ;;  %712 = vmatprep.mubr.bf16.mxu0 %v2174_v12  ;;  %v2169_v16 = vld [vmem:[%s2789_s3 + $0x30] sm:$0xff]   ;;  %v2171_v18 = vld [vmem:[%s2789_s3 + $0x38] sm:$0xff]  }
  0xba   : > { %1793 = vmatpush3.bf16.msra.mxu0 %v2159_v4  ;;  %1983 = vmatpush3.bf16.msra.mxu1 %v2159_v4  ;;  %v2172_v19 = vld [vmem:[%s2781_s25] ss:$8 sps:$4 sm:$0xff]   ;;  %v2178_v21 = vld [vmem:[%s2781_s25 + $0x14] ss:$8 sps:$4 sm:$0xff]   ;;  %v2182_v23 = vld [vmem:[%s2781_s25 + $0x10] ss:$8 sps:$4 sm:$0xff]  }
  0xbb   : > { %1794 = vmatprep.subr.bf16.mxu0 %v2160_v5  ;;  %1976 = vmatprep.subr.bf16.mxu1 %v2160_v5  ;;  %v2175_v20 = vld [vmem:[%s2781_s25 + $0x80] ss:$8 sps:$4 sm:$0xff]   ;;  %v2180_v22 = vld [vmem:[%s2781_s25 + $0x94] ss:$8 sps:$4 sm:$0xff]   ;;  %v2183_v24 = vld [vmem:[%s2781_s25 + $0x90] ss:$8 sps:$4 sm:$0xff]  }
  0xbc   : > { %776 = vmatprep.mubr.bf16.mxu1 %v2177_v13  ;;  %v2184_v25 = vld [vmem:[%s2781_s25 + $0x24] ss:$8 sps:$4 sm:$0xff]   ;;  %v2188_v27 = vld [vmem:[%s2781_s25 + $0x20] ss:$8 sps:$4 sm:$0xff]   ;;  %v2190_v29 = vld [vmem:[%s2781_s25 + $0x34] ss:$8 sps:$4 sm:$0xff]  }
  0xbd   : > { %v2186_v26 = vld [vmem:[%s2781_s25 + $0xa4] ss:$8 sps:$4 sm:$0xff]   ;;  %v2189_v28 = vld [vmem:[%s2781_s25 + $0xa0] ss:$8 sps:$4 sm:$0xff]   ;;  %v2192_v30 = vld [vmem:[%s2781_s25 + $0xb4] ss:$8 sps:$4 sm:$0xff]  }
  0xbe   : > { %1795 = vmatpush3.bf16.msra.mxu0 %v2161_v6  ;;  %1984 = vmatpush3.bf16.msra.mxu1 %v2161_v6  ;;  %v2194_v31 = vld [vmem:[%s2781_s25 + $0x30] ss:$8 sps:$4 sm:$0xff]   ;;  %v2196_v33 = vld [vmem:[%s2781_s25 + $0x44] ss:$8 sps:$4 sm:$0xff]   ;;  %v2200_v35 = vld [vmem:[%s2781_s25 + $0x40] ss:$8 sps:$4 sm:$0xff]  }
  0xbf   : > { %1796 = vmatprep.subr.bf16.mxu0 %v2162_v7  ;;  %1977 = vmatprep.subr.bf16.mxu1 %v2162_v7  ;;  %v2195_v32 = vld [vmem:[%s2781_s25 + $0xb0] ss:$8 sps:$4 sm:$0xff]   ;;  %v2198_v34 = vld [vmem:[%s2781_s25 + $0xc4] ss:$8 sps:$4 sm:$0xff]   ;;  %v2201_v36 = vld [vmem:[%s2781_s25 + $0xc0] ss:$8 sps:$4 sm:$0xff]  }
  0xc0   : > { %v2202_v37 = vld [vmem:[%s2781_s25 + $0x54] ss:$8 sps:$4 sm:$0xff]   ;;  %v2206_v39 = vld [vmem:[%s2781_s25 + $0x50] ss:$8 sps:$4 sm:$0xff]   ;;  %v2208_v41 = vld [vmem:[%s2781_s25 + $0x64] ss:$8 sps:$4 sm:$0xff]  }
  0xc1   : > { %v2204_v38 = vld [vmem:[%s2781_s25 + $0xd4] ss:$8 sps:$4 sm:$0xff]   ;;  %v2207_v40 = vld [vmem:[%s2781_s25 + $0xd0] ss:$8 sps:$4 sm:$0xff]   ;;  %v2210_v42 = vld [vmem:[%s2781_s25 + $0xe4] ss:$8 sps:$4 sm:$0xff]  }
  0xc2   : > { %1797 = vmatpush3.bf16.msra.mxu0 %v2163_v8  ;;  %1985 = vmatpush3.bf16.msra.mxu1 %v2163_v8  ;;  %v2212_v43 = vld [vmem:[%s2781_s25 + $0x60] ss:$8 sps:$4 sm:$0xff]   ;;  %v2214_v45 = vld [vmem:[%s2781_s25 + $0x74] ss:$8 sps:$4 sm:$0xff]   ;;  %v2218_v47 = vld [vmem:[%s2781_s25 + $0x70] ss:$8 sps:$4 sm:$0xff]  }
  0xc3   : > { %1798 = vmatprep.subr.bf16.mxu0 %v2164_v9  ;;  %1978 = vmatprep.subr.bf16.mxu1 %v2164_v9  ;;  %v2213_v44 = vld [vmem:[%s2781_s25 + $0xe0] ss:$8 sps:$4 sm:$0xff]   ;;  %v2216_v46 = vld [vmem:[%s2781_s25 + $0xf4] ss:$8 sps:$4 sm:$0xff]   ;;  %v2219_v48 = vld [vmem:[%s2781_s25 + $0xf0] ss:$8 sps:$4 sm:$0xff]  }
  0xc4   : > { %v328_v51 = vld [vmem:[#allocation2] sm:$0xff]  ;;  %v329_v59 = vld [vmem:[#allocation2 + $0x8] sm:$0xff]  ;;  %v330_v7 = vld [vmem:[#allocation2 + $0x10] sm:$0xff]  ;;  %p1613_p5 = scmp.ne.s32.totalorder %s3058_s12, 1 }
  0xc5   : > { %v344_v53 = vld [vmem:[#allocation2 + $0x80] sm:$0xff]  ;;  %v345_v61 = vld [vmem:[#allocation2 + $0x88] sm:$0xff]  ;;  %v346_v9 = vld [vmem:[#allocation2 + $0x90] sm:$0xff]  ;;  %s3059_s15 = sld [smem:[#allocation24_spill]] (!%p1613_p5) }
  0xc6   : > { %1799 = vmatpush3.bf16.msra.mxu0 %v2165_v10  ;;  %1986 = vmatpush3.bf16.msra.mxu1 %v2165_v10 }
  0xc7   : > { %1800 = vmatprep.subr.bf16.mxu0 %v2166_v11  ;;  %1979 = vmatprep.subr.bf16.mxu1 %v2166_v11 }
  0xca   : > { %1801 = vmatpush3.bf16.msra.mxu0 %v2167_v14  ;;  %1987 = vmatpush3.bf16.msra.mxu1 %v2167_v14 }
  0xcb   : > { %1802 = vmatprep.subr.bf16.mxu0 %v2168_v15  ;;  %1980 = vmatprep.subr.bf16.mxu1 %v2168_v15  ;;  %v331_v15 = vld [vmem:[#allocation2 + $0x18] sm:$0xff] }
  0xce   : > { %1803 = vmatpush3.bf16.msra.mxu0 %v2169_v16  ;;  %1988 = vmatpush3.bf16.msra.mxu1 %v2169_v16 }
  0xcf   : > { %1804 = vmatprep.subr.bf16.mxu0 %v2170_v17  ;;  %1981 = vmatprep.subr.bf16.mxu1 %v2170_v17  ;;  %v347_v17 = vld [vmem:[#allocation2 + $0x98] sm:$0xff] }
  0xd2   : > { %1805 = vmatpush3.bf16.msra.mxu0 %v2171_v18  ;;  %1989 = vmatpush3.bf16.msra.mxu1 %v2171_v18 }
  0xd5   : > { %713 = vmatmul.mubr.bf16.vlgmr.msra.gmra.mrb[0].mxu0 %v2172_v19  ;;  %777 = vmatmul.mubr.bf16.vlgmr.msra.gmra.mrb[0].mxu1 %v2175_v20 }
  0xd6   : > { %720 = vmatprep.mubr.bf16.mxu0 %v2178_v21  ;;  %784 = vmatprep.mubr.bf16.mxu1 %v2180_v22 }
  0xdd   : > { %721 = vmatmul.mubr.bf16.gmra.mrb[4].mxu0 %v2182_v23  ;;  %785 = vmatmul.mubr.bf16.gmra.mrb[4].mxu1 %v2183_v24 }
  0xde   : > { %728 = vmatprep.mubr.bf16.mxu0 %v2184_v25  ;;  %792 = vmatprep.mubr.bf16.mxu1 %v2186_v26 }
  0xe5   : > { %729 = vmatmul.mubr.bf16.gmra.mrb[8].mxu0 %v2188_v27  ;;  %793 = vmatmul.mubr.bf16.gmra.mrb[8].mxu1 %v2189_v28  ;;  %v332_v27 = vld [vmem:[#allocation2 + $0x20] sm:$0xff] }
  0xe6   : > { %736 = vmatprep.mubr.bf16.mxu0 %v2190_v29  ;;  %800 = vmatprep.mubr.bf16.mxu1 %v2192_v30  ;;  %v348_v29 = vld [vmem:[#allocation2 + $0xa0] sm:$0xff] }
  0xed   : > { %737 = vmatmul.mubr.bf16.gmra.mrb[12].mxu0 %v2194_v31  ;;  %801 = vmatmul.mubr.bf16.gmra.mrb[12].mxu1 %v2195_v32 }
  0xee   : > { %744 = vmatprep.mubr.bf16.mxu0 %v2196_v33  ;;  %808 = vmatprep.mubr.bf16.mxu1 %v2198_v34 }
  0xf5   : > { %745 = vmatmul.mubr.bf16.gmra.mrb[16].mxu0 %v2200_v35  ;;  %809 = vmatmul.mubr.bf16.gmra.mrb[16].mxu1 %v2201_v36  ;;  %v333_v35 = vld [vmem:[#allocation2 + $0x28] sm:$0xff] }
  0xf6   : > { %752 = vmatprep.mubr.bf16.mxu0 %v2202_v37  ;;  %816 = vmatprep.mubr.bf16.mxu1 %v2204_v38  ;;  %v349_v37 = vld [vmem:[#allocation2 + $0xa8] sm:$0xff] }
  0xfd   : > { %753 = vmatmul.mubr.bf16.gmra.mrb[20].mxu0 %v2206_v39  ;;  %817 = vmatmul.mubr.bf16.gmra.mrb[20].mxu1 %v2207_v40 }
  0xfe   : > { %760 = vmatprep.mubr.bf16.mxu0 %v2208_v41  ;;  %824 = vmatprep.mubr.bf16.mxu1 %v2210_v42 }
 0x105   : > { %761 = vmatmul.mubr.bf16.gmra.mrb[24].mxu0 %v2212_v43  ;;  %825 = vmatmul.mubr.bf16.gmra.mrb[24].mxu1 %v2213_v44 }
 0x106   : > { %768 = vmatprep.mubr.bf16.mxu0 %v2214_v45  ;;  %832 = vmatprep.mubr.bf16.mxu1 %v2216_v46 }
 0x10d   : > { %769 = vmatmul.mubr.bf16.gmra.mrb[28].mxu0 %v2218_v47  ;;  %833 = vmatmul.mubr.bf16.gmra.mrb[28].mxu1 %v2219_v48  ;;  %v334_v47 = vld [vmem:[#allocation2 + $0x30] sm:$0xff] }
 0x1a8   : > { %v1806_v49 = vpop.f32.mrb[0].mxu0  ;;  %v1854_v50 = vpop.f32.mrb[0].mxu1 }
 0x1a9   : > { %v1807_v52 = vpop.f32.mrb[1].mxu0  ;;  %v1855_v54 = vpop.f32.mrb[1].mxu1 }
 0x1aa   : > { %v1808_v55 = vadd.f32 %v1807_v52, %v1806_v49  ;;  %v1856_v56 = vadd.f32 %v1855_v54, %v1854_v50  ;;  %v1809_v57 = vpop.f32.mrb[2].mxu0  ;;  %v1857_v58 = vpop.f32.mrb[2].mxu1  ;;  %v350_v49 = vld [vmem:[#allocation2 + $0xb0] sm:$0xff] }
 0x1ab   : > { %v1810_v60 = vpop.f32.mrb[3].mxu0  ;;  %v1858_v62 = vpop.f32.mrb[3].mxu1 }
 0x1ac   : > { %v841_v63 = vadd.f32 %v1808_v55, %v328_v51  ;;  %v857_v0 = vadd.f32 %v1856_v56, %v344_v53  ;;  %v1811_v1 = vadd.f32 %v1810_v60, %v1809_v57  ;;  %v1859_v2 = vadd.f32 %v1858_v62, %v1857_v58  ;;  %v335_v55 = vld [vmem:[#allocation2 + $0x38] sm:$0xff] }
 0x1ad   : > { %v351_v57 = vld [vmem:[#allocation2 + $0xb8] sm:$0xff] }
 0x1ae   : > { %873 = vst [vmem:[#allocation2] sm:$0xff] %v841_v63  ;;  %889 = vst [vmem:[#allocation2 + $0x80] sm:$0xff] %v857_v0  ;;  %v842_v3 = vadd.f32 %v1811_v1, %v329_v59  ;;  %v858_v4 = vadd.f32 %v1859_v2, %v345_v61 }
 0x1b0   : > { %874 = vst [vmem:[#allocation2 + $0x8] sm:$0xff] %v842_v3  ;;  %890 = vst [vmem:[#allocation2 + $0x88] sm:$0xff] %v858_v4  ;;  %v1812_v5 = vpop.f32.mrb[4].mxu0  ;;  %v1860_v6 = vpop.f32.mrb[4].mxu1  ;;  %v336_v3 = vld [vmem:[#allocation2 + $0x40] sm:$0xff] }
 0x1b1   : > { %v1813_v8 = vpop.f32.mrb[5].mxu0  ;;  %v1861_v10 = vpop.f32.mrb[5].mxu1 }
 0x1b2   : > { %v1814_v11 = vadd.f32 %v1813_v8, %v1812_v5  ;;  %v1862_v12 = vadd.f32 %v1861_v10, %v1860_v6  ;;  %v1815_v13 = vpop.f32.mrb[6].mxu0  ;;  %v1863_v14 = vpop.f32.mrb[6].mxu1  ;;  %v352_v5 = vld [vmem:[#allocation2 + $0xc0] sm:$0xff] }
 0x1b3   : > { %v1816_v16 = vpop.f32.mrb[7].mxu0  ;;  %v1864_v18 = vpop.f32.mrb[7].mxu1 }
 0x1b4   : > { %v843_v19 = vadd.f32 %v1814_v11, %v330_v7  ;;  %v859_v20 = vadd.f32 %v1862_v12, %v346_v9  ;;  %v1817_v21 = vadd.f32 %v1816_v16, %v1815_v13  ;;  %v1865_v22 = vadd.f32 %v1864_v18, %v1863_v14  ;;  %v337_v11 = vld [vmem:[#allocation2 + $0x48] sm:$0xff] }
 0x1b5   : > { %v353_v13 = vld [vmem:[#allocation2 + $0xc8] sm:$0xff] }
 0x1b6   : > { %875 = vst [vmem:[#allocation2 + $0x10] sm:$0xff] %v843_v19  ;;  %891 = vst [vmem:[#allocation2 + $0x90] sm:$0xff] %v859_v20  ;;  %v844_v23 = vadd.f32 %v1817_v21, %v331_v15  ;;  %v860_v24 = vadd.f32 %v1865_v22, %v347_v17 }
 0x1b8   : > { %876 = vst [vmem:[#allocation2 + $0x18] sm:$0xff] %v844_v23  ;;  %892 = vst [vmem:[#allocation2 + $0x98] sm:$0xff] %v860_v24  ;;  %v1818_v25 = vpop.f32.mrb[8].mxu0  ;;  %v1866_v26 = vpop.f32.mrb[8].mxu1  ;;  %v338_v23 = vld [vmem:[#allocation2 + $0x50] sm:$0xff] }
 0x1b9   : > { %v1819_v28 = vpop.f32.mrb[9].mxu0  ;;  %v1867_v30 = vpop.f32.mrb[9].mxu1 }
 0x1ba   : > { %v1820_v31 = vadd.f32 %v1819_v28, %v1818_v25  ;;  %v1868_v32 = vadd.f32 %v1867_v30, %v1866_v26  ;;  %v1821_v33 = vpop.f32.mrb[10].mxu0  ;;  %v1869_v34 = vpop.f32.mrb[10].mxu1  ;;  %v354_v25 = vld [vmem:[#allocation2 + $0xd0] sm:$0xff] }
 0x1bb   : > { %v1822_v36 = vpop.f32.mrb[11].mxu0  ;;  %v1870_v38 = vpop.f32.mrb[11].mxu1 }
 0x1bc   : > { %v845_v39 = vadd.f32 %v1820_v31, %v332_v27  ;;  %v861_v40 = vadd.f32 %v1868_v32, %v348_v29  ;;  %v1823_v41 = vadd.f32 %v1822_v36, %v1821_v33  ;;  %v1871_v42 = vadd.f32 %v1870_v38, %v1869_v34  ;;  %v339_v31 = vld [vmem:[#allocation2 + $0x58] sm:$0xff] }
 0x1bd   : > { %v355_v33 = vld [vmem:[#allocation2 + $0xd8] sm:$0xff] }
 0x1be   : > { %877 = vst [vmem:[#allocation2 + $0x20] sm:$0xff] %v845_v39  ;;  %893 = vst [vmem:[#allocation2 + $0xa0] sm:$0xff] %v861_v40  ;;  %v846_v43 = vadd.f32 %v1823_v41, %v333_v35  ;;  %v862_v44 = vadd.f32 %v1871_v42, %v349_v37 }
 0x1c0   : > { %878 = vst [vmem:[#allocation2 + $0x28] sm:$0xff] %v846_v43  ;;  %894 = vst [vmem:[#allocation2 + $0xa8] sm:$0xff] %v862_v44  ;;  %v1824_v45 = vpop.f32.mrb[12].mxu0  ;;  %v1872_v46 = vpop.f32.mrb[12].mxu1  ;;  %v340_v43 = vld [vmem:[#allocation2 + $0x60] sm:$0xff] }
 0x1c1   : > { %v1825_v48 = vpop.f32.mrb[13].mxu0  ;;  %v1873_v50 = vpop.f32.mrb[13].mxu1 }
 0x1c2   : > { %v1826_v51 = vadd.f32 %v1825_v48, %v1824_v45  ;;  %v1874_v52 = vadd.f32 %v1873_v50, %v1872_v46  ;;  %v1827_v53 = vpop.f32.mrb[14].mxu0  ;;  %v1875_v54 = vpop.f32.mrb[14].mxu1  ;;  %v356_v45 = vld [vmem:[#allocation2 + $0xe0] sm:$0xff] }
 0x1c3   : > { %v1828_v56 = vpop.f32.mrb[15].mxu0  ;;  %v1876_v58 = vpop.f32.mrb[15].mxu1 }
 0x1c4   : > { %v847_v59 = vadd.f32 %v1826_v51, %v334_v47  ;;  %v863_v60 = vadd.f32 %v1874_v52, %v350_v49  ;;  %v1829_v61 = vadd.f32 %v1828_v56, %v1827_v53  ;;  %v1877_v62 = vadd.f32 %v1876_v58, %v1875_v54  ;;  %v341_v51 = vld [vmem:[#allocation2 + $0x68] sm:$0xff] }
 0x1c5   : > { %v357_v53 = vld [vmem:[#allocation2 + $0xe8] sm:$0xff] }
 0x1c6   : > { %879 = vst [vmem:[#allocation2 + $0x30] sm:$0xff] %v847_v59  ;;  %895 = vst [vmem:[#allocation2 + $0xb0] sm:$0xff] %v863_v60  ;;  %v848_v63 = vadd.f32 %v1829_v61, %v335_v55  ;;  %v864_v0 = vadd.f32 %v1877_v62, %v351_v57 }
 0x1c8   : > { %880 = vst [vmem:[#allocation2 + $0x38] sm:$0xff] %v848_v63  ;;  %896 = vst [vmem:[#allocation2 + $0xb8] sm:$0xff] %v864_v0  ;;  %v1830_v1 = vpop.f32.mrb[16].mxu0  ;;  %v1878_v2 = vpop.f32.mrb[16].mxu1  ;;  %v342_v63 = vld [vmem:[#allocation2 + $0x70] sm:$0xff] }
 0x1c9   : > { %v1831_v4 = vpop.f32.mrb[17].mxu0  ;;  %v1879_v6 = vpop.f32.mrb[17].mxu1 }
 0x1ca   : > { %v1832_v7 = vadd.f32 %v1831_v4, %v1830_v1  ;;  %v1880_v8 = vadd.f32 %v1879_v6, %v1878_v2  ;;  %v1833_v9 = vpop.f32.mrb[18].mxu0  ;;  %v1881_v10 = vpop.f32.mrb[18].mxu1  ;;  %v358_v1 = vld [vmem:[#allocation2 + $0xf0] sm:$0xff] }
 0x1cb   : > { %v1834_v12 = vpop.f32.mrb[19].mxu0  ;;  %v1882_v14 = vpop.f32.mrb[19].mxu1 }
 0x1cc   : > { %v849_v15 = vadd.f32 %v1832_v7, %v336_v3  ;;  %v865_v16 = vadd.f32 %v1880_v8, %v352_v5  ;;  %v1835_v17 = vadd.f32 %v1834_v12, %v1833_v9  ;;  %v1883_v18 = vadd.f32 %v1882_v14, %v1881_v10  ;;  %v343_v7 = vld [vmem:[#allocation2 + $0x78] sm:$0xff] }
 0x1cd   : > { %v359_v9 = vld [vmem:[#allocation2 + $0xf8] sm:$0xff] }
 0x1ce   : > { %881 = vst [vmem:[#allocation2 + $0x40] sm:$0xff] %v849_v15  ;;  %897 = vst [vmem:[#allocation2 + $0xc0] sm:$0xff] %v865_v16  ;;  %v850_v19 = vadd.f32 %v1835_v17, %v337_v11  ;;  %v866_v20 = vadd.f32 %v1883_v18, %v353_v13  ;;  %v2220_v17 = vld [vmem:[#allocation8] sm:$0xff] (!%p1613_p5)   ;;  %v2221_v18 = vld [vmem:[#allocation8 + $0x8] sm:$0xff] (!%p1613_p5)  }
 0x1cf   : > { %1926 = vmatprep.subr.bf16.mxu0 (!%p1613_p5), %v2220_v17  ;;  %1990 = vmatprep.subr.bf16.mxu1 (!%p1613_p5), %v2220_v17 }
 0x1d0   : > { %882 = vst [vmem:[#allocation2 + $0x48] sm:$0xff] %v850_v19  ;;  %898 = vst [vmem:[#allocation2 + $0xc8] sm:$0xff] %v866_v20  ;;  %v1836_v21 = vpop.f32.mrb[20].mxu0  ;;  %v1884_v22 = vpop.f32.mrb[20].mxu1  ;;  %1927 = vmatpush3.bf16.msra.mxu0 (!%p1613_p5), %v2220_v17  ;;  %1998 = vmatpush3.bf16.msra.mxu1 (!%p1613_p5), %v2220_v17  ;;  %v2222_v19 = vld [vmem:[#allocation8 + $0x10] sm:$0xff] (!%p1613_p5)   ;;  %v2223_v20 = vld [vmem:[#allocation8 + $0x18] sm:$0xff] (!%p1613_p5)  }
 0x1d1   : > { %v1837_v24 = vpop.f32.mrb[21].mxu0  ;;  %v1885_v26 = vpop.f32.mrb[21].mxu1  ;;  %1928 = vmatprep.subr.bf16.mxu0 (!%p1613_p5), %v2221_v18  ;;  %1991 = vmatprep.subr.bf16.mxu1 (!%p1613_p5), %v2221_v18 }
 0x1d2   : > { %v1838_v27 = vadd.f32 %v1837_v24, %v1836_v21  ;;  %v1886_v28 = vadd.f32 %v1885_v26, %v1884_v22  ;;  %v1839_v29 = vpop.f32.mrb[22].mxu0  ;;  %v1887_v30 = vpop.f32.mrb[22].mxu1  ;;  %v909_v21 = vld [vmem:[#allocation2] sm:$0xff] (!%p1613_p5)  ;;  %v910_v22 = vld [vmem:[#allocation2 + $0x8] sm:$0xff] (!%p1613_p5) }
 0x1d3   : > { %v1840_v32 = vpop.f32.mrb[23].mxu0  ;;  %v1888_v34 = vpop.f32.mrb[23].mxu1  ;;  %v925_v26 = vld [vmem:[#allocation2 + $0x80] sm:$0xff] (!%p1613_p5) }
 0x1d4   : > { %v851_v35 = vadd.f32 %v1838_v27, %v338_v23  ;;  %v867_v36 = vadd.f32 %v1886_v28, %v354_v25  ;;  %v1841_v37 = vadd.f32 %v1840_v32, %v1839_v29  ;;  %v1889_v38 = vadd.f32 %v1888_v34, %v1887_v30  ;;  %1929 = vmatpush3.bf16.msra.mxu0 (!%p1613_p5), %v2221_v18  ;;  %v2857_v23 = vld [vmem:[%s3059_s15] ss:$0 sm:$0xff] (!%p1613_p5)  ;;  %v926_v27 = vld [vmem:[#allocation2 + $0x88] sm:$0xff] (!%p1613_p5) }
 0x1d5   : > { %1999 = vmatpush3.bf16.msra.mxu1 (!%p1613_p5), %v2221_v18  ;;  %1930 = vmatprep.subr.bf16.mxu0 (!%p1613_p5), %v2222_v19  ;;  %v948_v24 = vadd.f32 (!%p1613_p5), %v2857_v23, %v909_v21  ;;  %v949_v25 = vadd.f32 (!%p1613_p5), %v2857_v23, %v910_v22  ;;  %v964_v28 = vadd.f32 (!%p1613_p5), %v2857_v23, %v925_v26  ;;  %v2224_v32 = vld [vmem:[#allocation8 + $0x20] sm:$0xff] (!%p1613_p5)  }
 0x1d6   : > { %883 = vst [vmem:[#allocation2 + $0x50] sm:$0xff] %v851_v35  ;;  %899 = vst [vmem:[#allocation2 + $0xd0] sm:$0xff] %v867_v36  ;;  %v852_v39 = vadd.f32 %v1841_v37, %v339_v31  ;;  %v868_v40 = vadd.f32 %v1889_v38, %v355_v33  ;;  %1992 = vmatprep.subr.bf16.mxu1 (!%p1613_p5), %v2222_v19  ;;  %v965_v29 = vadd.f32 (!%p1613_p5), %v2857_v23, %v926_v27  ;;  %v2225_v37 = vld [vmem:[#allocation8 + $0x28] sm:$0xff] (!%p1613_p5)   ;;  %v911_v38 = vld [vmem:[#allocation2 + $0x10] sm:$0xff] (!%p1613_p5) }
 0x1d7   : > { %v980_v30 = vmax.f32 (!%p1613_p5), %v948_v24, 0.0  ;;  %v981_v31 = vmax.f32 (!%p1613_p5), %v949_v25, 0.0  ;;  %v996_v33 = vmax.f32 (!%p1613_p5), %v964_v28, 0.0 }
 0x1d8   : > { %884 = vst [vmem:[#allocation2 + $0x58] sm:$0xff] %v852_v39  ;;  %900 = vst [vmem:[#allocation2 + $0xd8] sm:$0xff] %v868_v40  ;;  %v1842_v41 = vpop.f32.mrb[24].mxu0  ;;  %v1890_v42 = vpop.f32.mrb[24].mxu1  ;;  %1931 = vmatpush3.bf16.msra.mxu0 (!%p1613_p5), %v2222_v19  ;;  %v997_v34 = vmax.f32 (!%p1613_p5), %v965_v29, 0.0  ;;  %v912_v39 = vld [vmem:[#allocation2 + $0x18] sm:$0xff] (!%p1613_p5) }
 0x1d9   : > { %v1843_v44 = vpop.f32.mrb[25].mxu0  ;;  %v1891_v46 = vpop.f32.mrb[25].mxu1  ;;  %2000 = vmatpush3.bf16.msra.mxu1 (!%p1613_p5), %v2222_v19  ;;  %1932 = vmatprep.subr.bf16.mxu0 (!%p1613_p5), %v2223_v20  ;;  %v1012_v35 = vpack.c.bf16 (!%p1613_p5), %v981_v31, %v980_v30  ;;  %v927_v40 = vld [vmem:[#allocation2 + $0x90] sm:$0xff] (!%p1613_p5) }
 0x1da   : > { %v1844_v47 = vadd.f32 %v1843_v44, %v1842_v41  ;;  %v1892_v48 = vadd.f32 %v1891_v46, %v1890_v42  ;;  %v1845_v49 = vpop.f32.mrb[26].mxu0  ;;  %v1893_v50 = vpop.f32.mrb[26].mxu1  ;;  %1993 = vmatprep.subr.bf16.mxu1 (!%p1613_p5), %v2223_v20  ;;  %v1020_v36 = vpack.c.bf16 (!%p1613_p5), %v997_v34, %v996_v33  ;;  %v928_v41 = vld [vmem:[#allocation2 + $0x98] sm:$0xff] (!%p1613_p5)  ;;  %v913_v42 = vld [vmem:[#allocation2 + $0x20] sm:$0xff] (!%p1613_p5)  ;;  %v2226_v44 = vld [vmem:[#allocation8 + $0x30] sm:$0xff] (!%p1613_p5)   ;;  %v951_v46 = vadd.f32 (!%p1613_p5), %v2857_v23, %v912_v39 }
 0x1db   : > { %v1846_v52 = vpop.f32.mrb[27].mxu0  ;;  %v1894_v54 = vpop.f32.mrb[27].mxu1  ;;  %1942 = vmatprep.mubr.bf16.mxu0 (!%p1613_p5), %v1012_v35 }
 0x1dc   : > { %v853_v55 = vadd.f32 %v1844_v47, %v340_v43  ;;  %v869_v56 = vadd.f32 %v1892_v48, %v356_v45  ;;  %v1847_v57 = vadd.f32 %v1846_v52, %v1845_v49  ;;  %v1895_v58 = vadd.f32 %v1894_v54, %v1893_v50  ;;  %1933 = vmatpush3.bf16.msra.mxu0 (!%p1613_p5), %v2223_v20  ;;  %v914_v43 = vld [vmem:[#allocation2 + $0x28] sm:$0xff] (!%p1613_p5)  ;;  %v929_v47 = vld [vmem:[#allocation2 + $0xa0] sm:$0xff] (!%p1613_p5) }
 0x1dd   : > { %2001 = vmatpush3.bf16.msra.mxu1 (!%p1613_p5), %v2223_v20  ;;  %1934 = vmatprep.subr.bf16.mxu0 (!%p1613_p5), %v2224_v32  ;;  %v950_v45 = vadd.f32 (!%p1613_p5), %v2857_v23, %v911_v38  ;;  %v930_v48 = vld [vmem:[#allocation2 + $0xa8] sm:$0xff] (!%p1613_p5)  ;;  %v966_v49 = vadd.f32 (!%p1613_p5), %v2857_v23, %v927_v40  ;;  %v967_v50 = vadd.f32 (!%p1613_p5), %v2857_v23, %v928_v41  ;;  %v919_v22 = vld [vmem:[#allocation2 + $0x50] sm:$0xff] (!%p1613_p5) }
 0x1de   : > { %885 = vst [vmem:[#allocation2 + $0x60] sm:$0xff] %v853_v55  ;;  %901 = vst [vmem:[#allocation2 + $0xe0] sm:$0xff] %v869_v56  ;;  %v854_v59 = vadd.f32 %v1847_v57, %v341_v51  ;;  %v870_v60 = vadd.f32 %v1895_v58, %v357_v53  ;;  %1994 = vmatprep.subr.bf16.mxu1 (!%p1613_p5), %v2224_v32  ;;  %1958 = vmatprep.mubr.bf16.mxu1 (!%p1613_p5), %v1020_v36  ;;  %v2227_v55 = vld [vmem:[#allocation8 + $0x38] sm:$0xff] (!%p1613_p5)   ;;  %v983_v57 = vmax.f32 (!%p1613_p5), %v951_v46, 0.0  ;;  %v935_v29 = vld [vmem:[#allocation2 + $0xd0] sm:$0xff] (!%p1613_p5) }
 0x1df   : > { %v952_v51 = vadd.f32 (!%p1613_p5), %v2857_v23, %v913_v42  ;;  %v953_v52 = vadd.f32 (!%p1613_p5), %v2857_v23, %v914_v43  ;;  %v968_v53 = vadd.f32 (!%p1613_p5), %v2857_v23, %v929_v47  ;;  %v969_v54 = vadd.f32 (!%p1613_p5), %v2857_v23, %v930_v48  ;;  %v920_v24 = vld [vmem:[#allocation2 + $0x58] sm:$0xff] (!%p1613_p5) }
 0x1e0   : > { %886 = vst [vmem:[#allocation2 + $0x68] sm:$0xff] %v854_v59  ;;  %902 = vst [vmem:[#allocation2 + $0xe8] sm:$0xff] %v870_v60  ;;  %v1848_v61 = vpop.f32.mrb[28].mxu0  ;;  %v1896_v62 = vpop.f32.mrb[28].mxu1  ;;  %1935 = vmatpush3.bf16.msra.mxu0 (!%p1613_p5), %v2224_v32  ;;  %v982_v56 = vmax.f32 (!%p1613_p5), %v950_v45, 0.0  ;;  %v998_v58 = vmax.f32 (!%p1613_p5), %v966_v49, 0.0  ;;  %v959_v38 = vadd.f32 (!%p1613_p5), %v2857_v23, %v920_v24  ;;  %v974_v39 = vadd.f32 (!%p1613_p5), %v2857_v23, %v935_v29 }
 0x1e1   : > { %v1849_v0 = vpop.f32.mrb[29].mxu0  ;;  %v1897_v2 = vpop.f32.mrb[29].mxu1  ;;  %2002 = vmatpush3.bf16.msra.mxu1 (!%p1613_p5), %v2224_v32  ;;  %1936 = vmatprep.subr.bf16.mxu0 (!%p1613_p5), %v2225_v37  ;;  %v999_v59 = vmax.f32 (!%p1613_p5), %v967_v50, 0.0  ;;  %v984_v60 = vmax.f32 (!%p1613_p5), %v952_v51, 0.0  ;;  %v936_v30 = vld [vmem:[#allocation2 + $0xd8] sm:$0xff] (!%p1613_p5) }
 0x1e2   : > { %v1850_v3 = vadd.f32 %v1849_v0, %v1848_v61  ;;  %v1898_v4 = vadd.f32 %v1897_v2, %v1896_v62  ;;  %v1851_v5 = vpop.f32.mrb[30].mxu0  ;;  %v1899_v6 = vpop.f32.mrb[30].mxu1  ;;  %908 = sbr.rel (%p1613_p5) target bundleno = 738 (0x2e2), region = 56  ;;  %1995 = vmatprep.subr.bf16.mxu1 (!%p1613_p5), %v2225_v37  ;;  %v985_v61 = vmax.f32 (!%p1613_p5), %v953_v52, 0.0  ;;  %v915_v62 = vld [vmem:[#allocation2 + $0x30] sm:$0xff] (!%p1613_p5)  ;;  %v1001_v2 = vmax.f32 (!%p1613_p5), %v969_v54, 0.0 }
 0x1e3   : > { %v1852_v8 = vpop.f32.mrb[31].mxu0  ;;  %v1900_v10 = vpop.f32.mrb[31].mxu1  ;;  %v931_v0 = vld [vmem:[#allocation2 + $0xb0] sm:$0xff] (!%p1613_p5)  ;;  %v975_v40 = vadd.f32 (!%p1613_p5), %v2857_v23, %v936_v30  ;;  %v991_v50 = vmax.f32 (!%p1613_p5), %v959_v38, 0.0  ;;  %v1006_v51 = vmax.f32 (!%p1613_p5), %v974_v39, 0.0 }
 0x1e4   : > { %v855_v11 = vadd.f32 %v1850_v3, %v342_v63  ;;  %v871_v12 = vadd.f32 %v1898_v4, %v358_v1  ;;  %v1853_v13 = vadd.f32 %v1852_v8, %v1851_v5  ;;  %v1901_v14 = vadd.f32 %v1900_v10, %v1899_v6  ;;  %1937 = vmatpush3.bf16.msra.mxu0 (!%p1613_p5), %v2225_v37  ;;  %v916_v63 = vld [vmem:[#allocation2 + $0x38] sm:$0xff] (!%p1613_p5)  ;;  %v917_v4 = vld [vmem:[#allocation2 + $0x40] sm:$0xff] (!%p1613_p5)  ;;  %v918_v5 = vld [vmem:[#allocation2 + $0x48] sm:$0xff] (!%p1613_p5) }
 0x1e5   : > { %2003 = vmatpush3.bf16.msra.mxu1 (!%p1613_p5), %v2225_v37  ;;  %1938 = vmatprep.subr.bf16.mxu0 (!%p1613_p5), %v2226_v44  ;;  %v1000_v1 = vmax.f32 (!%p1613_p5), %v968_v53, 0.0  ;;  %v932_v3 = vld [vmem:[#allocation2 + $0xb8] sm:$0xff] (!%p1613_p5)  ;;  %v1013_v6 = vpack.c.bf16 (!%p1613_p5), %v983_v57, %v982_v56  ;;  %v934_v8 = vld [vmem:[#allocation2 + $0xc8] sm:$0xff] (!%p1613_p5)  ;;  %v954_v10 = vadd.f32 (!%p1613_p5), %v2857_v23, %v915_v62  ;;  %v921_v33 = vld [vmem:[#allocation2 + $0x60] sm:$0xff] (!%p1613_p5)  ;;  %v958_v37 = vadd.f32 (!%p1613_p5), %v2857_v23, %v919_v22 }
 0x1e6   : > { %887 = vst [vmem:[#allocation2 + $0x70] sm:$0xff] %v855_v11  ;;  %903 = vst [vmem:[#allocation2 + $0xf0] sm:$0xff] %v871_v12  ;;  %v856_v15 = vadd.f32 %v1853_v13, %v343_v7  ;;  %v872_v16 = vadd.f32 %v1901_v14, %v359_v9  ;;  %1996 = vmatprep.subr.bf16.mxu1 (!%p1613_p5), %v2226_v44  ;;  %v933_v7 = vld [vmem:[#allocation2 + $0xc0] sm:$0xff] (!%p1613_p5)  ;;  %v1021_v9 = vpack.c.bf16 (!%p1613_p5), %v999_v59, %v998_v58 }
 0x1e7   : > { %v955_v11 = vadd.f32 (!%p1613_p5), %v2857_v23, %v916_v63  ;;  %v970_v12 = vadd.f32 (!%p1613_p5), %v2857_v23, %v931_v0  ;;  %v1014_v13 = vpack.c.bf16 (!%p1613_p5), %v985_v61, %v984_v60  ;;  %v971_v14 = vadd.f32 (!%p1613_p5), %v2857_v23, %v932_v3  ;;  %v922_v34 = vld [vmem:[#allocation2 + $0x68] sm:$0xff] (!%p1613_p5)  ;;  %v937_v35 = vld [vmem:[#allocation2 + $0xe0] sm:$0xff] (!%p1613_p5) }
 0x1e8   : > { %888 = vst [vmem:[#allocation2 + $0x78] sm:$0xff] %v856_v15  ;;  %904 = vst [vmem:[#allocation2 + $0xf8] sm:$0xff] %v872_v16  ;;  %1939 = vmatpush3.bf16.msra.mxu0 (!%p1613_p5), %v2226_v44  ;;  %v956_v15 = vadd.f32 (!%p1613_p5), %v2857_v23, %v917_v4  ;;  %v957_v16 = vadd.f32 (!%p1613_p5), %v2857_v23, %v918_v5  ;;  %v1022_v17 = vpack.c.bf16 (!%p1613_p5), %v1001_v2, %v1000_v1  ;;  %v938_v36 = vld [vmem:[#allocation2 + $0xe8] sm:$0xff] (!%p1613_p5) }
 0x1e9   : > { %2004 = vmatpush3.bf16.msra.mxu1 %v2226_v44  ;;  %1940 = vmatprep.subr.bf16.mxu0 %v2227_v55  ;;  %v972_v18 = vadd.f32 %v2857_v23, %v933_v7  ;;  %v973_v19 = vadd.f32 %v2857_v23, %v934_v8  ;;  %v986_v20 = vmax.f32 %v954_v10, 0.0  ;;  %v987_v21 = vmax.f32 %v955_v11, 0.0 }
 0x1ea   : > { %1997 = vmatprep.subr.bf16.mxu1 %v2227_v55  ;;  %v1002_v25 = vmax.f32 %v970_v12, 0.0  ;;  %v1003_v26 = vmax.f32 %v971_v14, 0.0  ;;  %v988_v27 = vmax.f32 %v956_v15, 0.0  ;;  %v989_v28 = vmax.f32 %v957_v16, 0.0 }
 0x1eb   : > { %v1004_v31 = vmax.f32 %v972_v18, 0.0  ;;  %v1005_v32 = vmax.f32 %v973_v19, 0.0  ;;  %v1015_v41 = vpack.c.bf16 %v987_v21, %v986_v20  ;;  %v960_v44 = vadd.f32 %v2857_v23, %v921_v33 }
 0x1ec   : > { %1941 = vmatpush3.bf16.msra.mxu0 %v2227_v55  ;;  %v1023_v42 = vpack.c.bf16 %v1003_v26, %v1002_v25  ;;  %v1016_v43 = vpack.c.bf16 %v989_v28, %v988_v27  ;;  %v961_v46 = vadd.f32 %v2857_v23, %v922_v34  ;;  %v976_v47 = vadd.f32 %v2857_v23, %v937_v35 }
 0x1ed   : > { %2005 = vmatpush3.bf16.msra.mxu1 %v2227_v55  ;;  %v1024_v45 = vpack.c.bf16 %v1005_v32, %v1004_v31  ;;  %v977_v48 = vadd.f32 %v2857_v23, %v938_v36  ;;  %v990_v49 = vmax.f32 %v958_v37, 0.0  ;;  %v1007_v52 = vmax.f32 %v975_v40, 0.0  ;;  %v923_v53 = vld [vmem:[#allocation2 + $0x70] sm:$0xff] }
 0x1ee   : > { %v992_v55 = vmax.f32 %v960_v44, 0.0  ;;  %v993_v56 = vmax.f32 %v961_v46, 0.0  ;;  %v1008_v57 = vmax.f32 %v976_v47, 0.0  ;;  %v939_v59 = vld [vmem:[#allocation2 + $0xf0] sm:$0xff]  ;;  %v962_v63 = vadd.f32 %v2857_v23, %v923_v53 }
 0x1ef   : > { %1943 = vmatmul.mubr.bf16.vlgmr.msra.gmra.mrb[0].mxu0 %v1013_v6  ;;  %v924_v54 = vld [vmem:[#allocation2 + $0x78] sm:$0xff]  ;;  %v1009_v58 = vmax.f32 %v977_v48, 0.0  ;;  %v1017_v61 = vpack.c.bf16 %v991_v50, %v990_v49  ;;  %v1025_v62 = vpack.c.bf16 %v1007_v52, %v1006_v51  ;;  %v978_v1 = vadd.f32 %v2857_v23, %v939_v59 }
 0x1f0   : > { %1959 = vmatmul.mubr.bf16.vlgmr.msra.gmra.mrb[0].mxu1 %v1021_v9  ;;  %1946 = vmatprep.mubr.bf16.mxu0 %v1014_v13  ;;  %v940_v60 = vld [vmem:[#allocation2 + $0xf8] sm:$0xff]  ;;  %v963_v0 = vadd.f32 %v2857_v23, %v924_v54  ;;  %v1018_v3 = vpack.c.bf16 %v993_v56, %v992_v55  ;;  %v994_v5 = vmax.f32 %v962_v63, 0.0 }
 0x1f1   : > { %1962 = vmatprep.mubr.bf16.mxu1 %v1022_v17  ;;  %v979_v2 = vadd.f32 %v2857_v23, %v940_v60  ;;  %v1026_v4 = vpack.c.bf16 %v1009_v58, %v1008_v57  ;;  %v1010_v7 = vmax.f32 %v978_v1, 0.0 }
 0x1f2   : > { %v995_v6 = vmax.f32 %v963_v0, 0.0 }
 0x1f3   : > { %v1011_v8 = vmax.f32 %v979_v2, 0.0 }
 0x1f4   : > { %v1019_v9 = vpack.c.bf16 %v995_v6, %v994_v5 }
 0x1f5   : > { %v1027_v10 = vpack.c.bf16 %v1011_v8, %v1010_v7 }
 0x1f7   : > { %1947 = vmatmul.mubr.bf16.gmra.mrb[4].mxu0 %v1015_v41 }
 0x1f8   : > { %1963 = vmatmul.mubr.bf16.gmra.mrb[4].mxu1 %v1023_v42  ;;  %1950 = vmatprep.mubr.bf16.mxu0 %v1016_v43 }
 0x1f9   : > { %1966 = vmatprep.mubr.bf16.mxu1 %v1024_v45 }
 0x1ff   : > { %1951 = vmatmul.mubr.bf16.gmra.mrb[8].mxu0 %v1017_v61 }
 0x200   : > { %1967 = vmatmul.mubr.bf16.gmra.mrb[8].mxu1 %v1025_v62  ;;  %1954 = vmatprep.mubr.bf16.mxu0 %v1018_v3 }
 0x201   : > { %1970 = vmatprep.mubr.bf16.mxu1 %v1026_v4 }
 0x207   : > { %1955 = vmatmul.mubr.bf16.gmra.mrb[12].mxu0 %v1019_v9 }
 0x208   : > { %1971 = vmatmul.mubr.bf16.gmra.mrb[12].mxu1 %v1027_v10 }
 0x2c2   : > { %v1944_v11 = vpop.f32.mrb[0].mxu0 }
 0x2c3   : > { %v1960_v23 = vpop.f32.mrb[0].mxu1  ;;  %v1126_v12 = vpop.f32.mrb[1].mxu0 }
 0x2c4   : > { %v1190_v13 = vpop.f32.mrb[1].mxu1  ;;  %v1945_v14 = vpop.f32.mrb[2].mxu0 }
 0x2c5   : > { %v1961_v15 = vpop.f32.mrb[2].mxu1  ;;  %v1703_v16 = vpack.c.bf16 %v1945_v14, %v1944_v11  ;;  %v1129_v18 = vpop.f32.mrb[3].mxu0 }
 0x2c6   : > { %v1743_v17 = vpack.c.bf16 %v1961_v15, %v1960_v23  ;;  %v1193_v19 = vpop.f32.mrb[3].mxu1  ;;  %v1698_v20 = vpack.c.bf16 %v1129_v18, %v1126_v12 }
 0x2c7   : > { %v1738_v21 = vpack.c.bf16 %v1193_v19, %v1190_v13  ;;  %1775 = vst [vmem:[%s2802_s9 + $0x8] sm:$0xff] %v1703_v16  }
 0x2c8   : > { %1783 = vst [vmem:[%s2802_s9 + $0x48] sm:$0xff] %v1743_v17   ;;  %1699 = vst [vmem:[%s2802_s9] sm:$0xff] %v1698_v20  }
 0x2c9   : > { %1782 = vst [vmem:[%s2802_s9 + $0x40] sm:$0xff] %v1738_v21  }
 0x2ca   : > { %v1948_v22 = vpop.f32.mrb[4].mxu0 }
 0x2cb   : > { %v1964_v24 = vpop.f32.mrb[4].mxu1  ;;  %v1142_v25 = vpop.f32.mrb[5].mxu0 }
 0x2cc   : > { %v1206_v26 = vpop.f32.mrb[5].mxu1  ;;  %v1949_v27 = vpop.f32.mrb[6].mxu0 }
 0x2cd   : > { %v1965_v28 = vpop.f32.mrb[6].mxu1  ;;  %v1713_v29 = vpack.c.bf16 %v1949_v27, %v1948_v22  ;;  %v1145_v31 = vpop.f32.mrb[7].mxu0 }
 0x2ce   : > { %v1753_v30 = vpack.c.bf16 %v1965_v28, %v1964_v24  ;;  %v1209_v32 = vpop.f32.mrb[7].mxu1  ;;  %v1708_v33 = vpack.c.bf16 %v1145_v31, %v1142_v25 }
 0x2cf   : > { %v1748_v34 = vpack.c.bf16 %v1209_v32, %v1206_v26  ;;  %1777 = vst [vmem:[%s2802_s9 + $0x18] sm:$0xff] %v1713_v29  }
 0x2d0   : > { %1785 = vst [vmem:[%s2802_s9 + $0x58] sm:$0xff] %v1753_v30   ;;  %1776 = vst [vmem:[%s2802_s9 + $0x10] sm:$0xff] %v1708_v33  }
 0x2d1   : > { %1784 = vst [vmem:[%s2802_s9 + $0x50] sm:$0xff] %v1748_v34  }
 0x2d2   : > { %v1952_v35 = vpop.f32.mrb[8].mxu0 }
 0x2d3   : > { %v1968_v36 = vpop.f32.mrb[8].mxu1  ;;  %v1158_v37 = vpop.f32.mrb[9].mxu0 }
 0x2d4   : > { %v1222_v38 = vpop.f32.mrb[9].mxu1  ;;  %v1953_v39 = vpop.f32.mrb[10].mxu0 }
 0x2d5   : > { %v1969_v40 = vpop.f32.mrb[10].mxu1  ;;  %v1723_v41 = vpack.c.bf16 %v1953_v39, %v1952_v35  ;;  %v1161_v43 = vpop.f32.mrb[11].mxu0 }
 0x2d6   : > { %v1763_v42 = vpack.c.bf16 %v1969_v40, %v1968_v36  ;;  %v1225_v44 = vpop.f32.mrb[11].mxu1  ;;  %v1718_v45 = vpack.c.bf16 %v1161_v43, %v1158_v37 }
 0x2d7   : > { %v1758_v46 = vpack.c.bf16 %v1225_v44, %v1222_v38  ;;  %1779 = vst [vmem:[%s2802_s9 + $0x28] sm:$0xff] %v1723_v41  }
 0x2d8   : > { %1787 = vst [vmem:[%s2802_s9 + $0x68] sm:$0xff] %v1763_v42   ;;  %1778 = vst [vmem:[%s2802_s9 + $0x20] sm:$0xff] %v1718_v45  }
 0x2d9   : > { %1786 = vst [vmem:[%s2802_s9 + $0x60] sm:$0xff] %v1758_v46  }
 0x2da   : > { %v1956_v47 = vpop.f32.mrb[12].mxu0 }
 0x2db   : > { %v1972_v48 = vpop.f32.mrb[12].mxu1  ;;  %v1174_v49 = vpop.f32.mrb[13].mxu0 }
 0x2dc   : > { %v1238_v50 = vpop.f32.mrb[13].mxu1  ;;  %v1957_v51 = vpop.f32.mrb[14].mxu0 }
 0x2dd   : > { %v1973_v52 = vpop.f32.mrb[14].mxu1  ;;  %v1733_v53 = vpack.c.bf16 %v1957_v51, %v1956_v47  ;;  %v1177_v55 = vpop.f32.mrb[15].mxu0 }
 0x2de   : > { %v1773_v54 = vpack.c.bf16 %v1973_v52, %v1972_v48  ;;  %v1241_v56 = vpop.f32.mrb[15].mxu1  ;;  %v1728_v57 = vpack.c.bf16 %v1177_v55, %v1174_v49 }
 0x2df   : > { %v1768_v58 = vpack.c.bf16 %v1241_v56, %v1238_v50  ;;  %1781 = vst [vmem:[%s2802_s9 + $0x38] sm:$0xff] %v1733_v53  }
 0x2e0   : > { %1789 = vst [vmem:[%s2802_s9 + $0x78] sm:$0xff] %v1773_v54   ;;  %1780 = vst [vmem:[%s2802_s9 + $0x30] sm:$0xff] %v1728_v57  }
 0x2e1   : > { %1788 = vst [vmem:[%s2802_s9 + $0x70] sm:$0xff] %v1768_v58  }
 0x2e2 PF: > { %s3060_s14 = sld [smem:[#allocation17_spill]]  ;;  %s3062_s13 = sld [smem:[#allocation20_spill]] }
 0x2e3   : > { %s3063_s21 = sld [smem:[#allocation26_spill]]  ;;  %s1427_s6 = sshll.u32 %s2802_s9, 4  ;;  %s2914_s6 = int_to_ptr.vmem [resolvable:$true] %s1427_s6 }
 0x2e4   : > { %s2918_s5 = scalar_lea.sflag [#allocation5], %s284_s16  ;;  %s2316_s30 = scalar_lea.vmem %s2914_s6, 2048 }
 0x2e5   : > { %p2317_p2 = scmp.ne.s32.totalorder %s2914_s6, %s2316_s30  ;;  %s2481_s12 = smov [#allocation9]  }
 0x2e6   : > { %s2320_s24 = sshll.u32 %s2481_s12, 4  ;;  %s2321_s24 = int_to_ptr.vmem [resolvable:$false] %s2320_s24 }
 0x2e7   : > { %s2322_s2 = scalar_lea.vmem %s2321_s24, 4096  ;;  %p2323_p4 = scmp.lt.s32.totalorder %s2914_s6, %s2321_s24 }
 0x2e8   : > { %s1694_s29 = sshll.u32 %s3060_s14, 11  ;;  %p3065_p10 = scmp.ne.s32.totalorder %s3062_s13, 0 }
 0x2e9   : > { %s3064_s10 = smov %s3063_s21  ;;  %s2911_s3 = scalar_lea.hbm %s3063_s21, %s1694_s29 }
 0x2ea   : > { %p2318_p7 = pnand %p2317_p2, %p3065_p10  ;;  %p2324_p8 = scmp.lt.s32.totalorder %s2322_s2, %s2316_s30 }
 0x2ec   : > { %p2319_p11 = pneg %p2318_p7  ;;  %p2325_p12 = por %p2324_p8, %p2323_p4 }
 0x2ee   : > { %p2326_p13 = pnand %p2325_p12, %p2319_p11 }
 0x2f0   : > { %2329 = shalt.err (!%p2326_p13)
}
 0x2f1   : > { %s2330_s16 = scalar_lea.hbm %s2911_s3, 2048  ;;  %s2334_s14 = scalar_lea.hbm %s3064_s10, 4096 }
 0x2f2   : > { %p2331_p6 = scmp.ne.s32.totalorder %s2911_s3, %s2330_s16  ;;  %p2335_p3 = scmp.lt.u32.totalorder %s2911_s3, %s3064_s10 }
 0x2f3   : > { %p2336_p9 = scmp.lt.u32.totalorder %s2334_s14, %s2330_s16  ;;  %p2338_p2 = scmp.lt.u32.totalorder %s2330_s16, %s2911_s3 }
 0x2f4   : > { %p2332_p0 = pnand %p2331_p6, %p3065_p10 }
 0x2f5   : > { %p2337_p5 = por %p2336_p9, %p2335_p3 }
 0x2f6   : > { %p2333_p1 = pneg %p2332_p0 }
 0x2f7   : > { %p2339_p7 = por %p2338_p2, %p2337_p5 }
 0x2f9   : > { %p2340_p11 = pnand %p2339_p7, %p2333_p1 }
 0x2fb   : > { %2343 = shalt.err (!%p2340_p11)
}
 0x2fc   : > { %s2482_s8 = smov 64   ;;  %s2483_s11 = smov 4  }
 0x2fd   : > { %2014 = dma.vmem_to_hbm [thread:$0]  (%p3065_p10), %s2914_s6, 2048, %s2911_s3, %s2918_s5, %s2482_s8, %s2482_s8, %s2483_s11  }
 0x2fe PF: > { %s3066_s21 = sld [smem:[#allocation14_spill]]  ;;  %s3067_s30 = sld [smem:[#allocation21_spill]] }
 0x2ff   : > { %p2034_p4 = scmp.ge.s32.totalorder %s2470_s28, 2 }
 0x304   : > { %s1442_s12 = sand.u32 1, %s3066_s21   ;;  %p3068_p8 = scmp.ne.s32.totalorder %s3067_s30, 0 }
 0x305   : > { %s1443_s24 = scalar_lea.sflag [#allocation5], %s1442_s12 }
 0x306   : > { %p2028_p12 = pnand %p2034_p4, %p3068_p8 }
 0x308   : > { %2413 = dma.done.wait (!%p2028_p12), %s1443_s24, 2048  }
 0x309   : > { %2415 = vsyncadd (!%p2028_p12), %s1443_s24, 4294965248  ;;  %s23_s28 = sadd.s32 1, %s2470_s28   ;;  %s3070_s15 = sld [smem:[#allocation15_spill]] }
 0x30a   : > { %p2947_p13 = scmp.ge.s32.totalorder %s23_s28, 6   ;;  %s3071_s13 = sld [smem:[#allocation22_spill]] }
 0x30b   : > { %s3072_s3 = sld [smem:[#allocation23_spill]]  ;;  %s3073_s16 = smov %s2426_s17 }
 0x30c   : > { %s3074_s17 = smov %s2672_s18  ;;  %s3075_s18 = smov %s2434_s19 }
 0x30d   : > { %s3076_s19 = smov %s2438_s20  ;;  %s3077_s20 = smov %s2728_s7 }
 0x30e   : > { %s3078_s21 = smov %s2446_s22  ;;  %s3079_s22 = smov %s2450_s23 }
 0x30f   : > { %s3080_s23 = smov %s2675_s4  ;;  %s3081_s24 = smov %s2462_s26 }
 0x310   : > { %s3082_s25 = smov %s2466_s27  ;;  %s3083_s26 = smov %s3071_s13 }
 0x311   : > { %s3084_s27 = smov %s3072_s3  ;;  %22 = sbr.rel (!%p2947_p13) target bundleno = 16 (0x10), region = 106 }
 0x318   :  { %1448 = vsyncpa [#allocation4], 1 }
 0x319   :  { %1450 = vsyncpa [#allocation4 + $0x1], 1 }
 0x31a   :  { %1451 = vsyncpa [#allocation7], 1 }
 0x31b   :  { %1453 = vsyncpa [#allocation7 + $0x1], 1 }
 0x31c   :  { %1454 = vsyncpa [#allocation5], 1 }
 0x31d   :  { %1456 = vsyncpa [#allocation5 + $0x1], 1 }

</bundles_post_ra>
